<compile_context>
chip_gen: v6e
topology: v6e:2x2x1
jax: 0.10.0
libtpu: 0.0.40
codegen_flags: <defaults>
</compile_context>

<pallas_src>
import math

import jax
import jax.numpy as jnp
from jax.experimental import pallas as pl
from jax.experimental.pallas import tpu as pltpu

# ----------------------------- config ---------------------------------------
DIM_IN = 16                 # e.g. 3D position + encoding features
DIM_OUT = 4                 # e.g. sdf + 3 feature channels
N_NEURONS = 64
N_HIDDEN_LAYERS = 2
SPHERE_INIT_RADIUS = 0.5
INSIDE_OUT = False

SOFTPLUS_BETA = 100.0
SOFTPLUS_THRESHOLD = 20.0   # nn.Softplus default threshold

TILE_N = 256                # batch tile (sublane axis); >=2 grid steps in demo
LANE = 128                  # TPU lane width for lane-dense output padding


def _round_up(x, m):
    return ((x + m - 1) // m) * m


# ----------------------------- kernel ---------------------------------------
def _softplus_beta100(x):
    # PyTorch: (1/beta) * log(1 + exp(beta*x)); linear when beta*x > threshold.
    bx = SOFTPLUS_BETA * x
    sp = jnp.log1p(jnp.exp(jnp.minimum(bx, SOFTPLUS_THRESHOLD))) / SOFTPLUS_BETA
    return jnp.where(bx > SOFTPLUS_THRESHOLD, x, sp)


def _mlp_kernel(x_ref, *refs):
    # x_ref:  (TILE_N, DIM_IN)
    # refs:   w0_t, b0, w1_t, b1, ..., wL_t, bL, o_ref
    #         wi_t: (in_dim, out_dim) weight-norm-resolved, pre-transposed
    #         bi:   (1, out_dim)
    # o_ref:  (TILE_N, DOUT_PAD)  (lane-dense, zero-padded columns)
    o_ref = refs[-1]
    params = refs[:-1]
    n_linear = len(params) // 2

    h = x_ref[...]
    for i in range(n_linear):
        w_t = params[2 * i][...]
        b = params[2 * i + 1][...]
        h = jnp.dot(h, w_t, preferred_element_type=jnp.float32) + b
        if i < n_linear - 1:
            h = _softplus_beta100(h)
    # output_activation = identity (config default None)
    o_ref[...] = h


# ----------------------------- wrapper ---------------------------------------
def _resolve_weight_norm(v, g):
    # nn.utils.weight_norm(dim=0): W[o,:] = g[o] * v[o,:] / ||v[o,:]||
    norm = jnp.sqrt(jnp.sum(v * v, axis=1, keepdims=True))
    return (g.reshape(-1, 1) / norm) * v


@jax.jit
def sphere_init_vanilla_mlp(x, params):
    """x: (N, DIM_IN) float32; params: list of (v, g, b) per Linear -> (N, DIM_OUT)."""
    n, din = x.shape
    n_linear = len(params)
    dout = params[-1][0].shape[0]
    dout_pad = _round_up(dout, LANE)

    # Resolve weight-norm, transpose to (in, out), lane-pad the last layer.
    kernel_args = []
    for i, (v, g, b) in enumerate(params):
        w_t = _resolve_weight_norm(v.astype(jnp.float32),
                                   g.astype(jnp.float32)).T
        b_row = b.reshape(1, -1).astype(jnp.float32)
        if i == n_linear - 1 and dout_pad != dout:
            w_t = jnp.pad(w_t, ((0, 0), (0, dout_pad - dout)))
            b_row = jnp.pad(b_row, ((0, 0), (0, dout_pad - dout)))
        kernel_args += [w_t, b_row]

    # Pad batch to a multiple of TILE_N (zero rows flow through harmlessly).
    n_pad = _round_up(max(n, 1), TILE_N)
    x_pad = jnp.pad(x.astype(jnp.float32), ((0, n_pad - n), (0, 0)))

    in_specs = [pl.BlockSpec((TILE_N, din), lambda i: (i, 0))]
    for a in kernel_args:                     # full-array resident blocks
        in_specs.append(pl.BlockSpec(a.shape, lambda i: (0, 0)))

    out = pl.pallas_call(
        _mlp_kernel,
        out_shape=jax.ShapeDtypeStruct((n_pad, dout_pad), jnp.float32),
        grid_spec=pltpu.PrefetchScalarGridSpec(
            num_scalar_prefetch=0,
            grid=(n_pad // TILE_N,),
            in_specs=in_specs,
            out_specs=pl.BlockSpec((TILE_N, dout_pad), lambda i: (i, 0)),
        ),
        compiler_params=pltpu.CompilerParams(
            dimension_semantics=("parallel",),
            vmem_limit_bytes=32 * 1024 * 1024,
        ),
    )(x_pad, *kernel_args)

    return out[:n, :dout]


# ------------------------ parameter init (sphere init) -----------------------
def init_params(key):
    """Replicates SphereInitVanillaMLP.make_linear init + weight_norm params."""
    n_linear = N_HIDDEN_LAYERS + 1
    keys = jax.random.split(key, 2 * n_linear)
    params = []

    def make_g(v, k):
        # weight_norm init sets g = ||v||_row; perturb slightly so the
        # weight-norm path is exercised non-trivially in the test.
        norm = jnp.sqrt(jnp.sum(v * v, axis=1))
        return norm * jax.random.uniform(k, norm.shape, minval=0.9, maxval=1.1)

    # first layer: bias 0, weight[:, 3:] = 0, weight[:, :3] ~ N(0, sqrt(2)/sqrt(H))
    std0 = math.sqrt(2.0) / math.sqrt(N_NEURONS)
    w0 = jnp.zeros((N_NEURONS, DIM_IN), jnp.float32)
    w0 = w0.at[:, :3].set(std0 * jax.random.normal(keys[0], (N_NEURONS, 3)))
    params.append((w0, make_g(w0, keys[1]), jnp.zeros((N_NEURONS,), jnp.float32)))

    # hidden layers: bias 0, weight ~ N(0, sqrt(2)/sqrt(H))
    for i in range(N_HIDDEN_LAYERS - 1):
        k_w, k_g = keys[2 + 2 * i], keys[3 + 2 * i]
        w = std0 * jax.random.normal(k_w, (N_NEURONS, N_NEURONS), jnp.float32)
        params.append((w, make_g(w, k_g), jnp.zeros((N_NEURONS,), jnp.float32)))

    # last layer: sphere init
    mean = math.sqrt(math.pi) / math.sqrt(N_NEURONS)
    if INSIDE_OUT:
        mean = -mean
        b_last = jnp.full((DIM_OUT,), SPHERE_INIT_RADIUS, jnp.float32)
    else:
        b_last = jnp.full((DIM_OUT,), -SPHERE_INIT_RADIUS, jnp.float32)
    k_w, k_g = keys[-2], keys[-1]
    w_last = mean + 1e-4 * jax.random.normal(k_w, (DIM_OUT, N_NEURONS), jnp.float32)
    params.append((w_last, make_g(w_last, k_g), b_last))
    return params


# ------------------------ pure-JAX reference ---------------------------------
def sphere_init_vanilla_mlp_ref(x, params):
    h = x.astype(jnp.float32)
    n_linear = len(params)
    for i, (v, g, b) in enumerate(params):
        w = _resolve_weight_norm(v, g)                      # (out, in)
        h = h @ w.T + b.reshape(1, -1)
        if i < n_linear - 1:
            h = _softplus_beta100(h)
    return h                                                # identity output act


# ----------------------------- main ------------------------------------------
if __name__ == "__main__":
    key = jax.random.PRNGKey(0)
    k_x, k_p = jax.random.split(key)

    n_points = 512                                   # -> 2 grid steps at TILE_N=256
    x = jax.random.uniform(k_x, (n_points, DIM_IN), jnp.float32,
                           minval=-1.0, maxval=1.0)
    params = init_params(k_p)

    out = sphere_init_vanilla_mlp(x, params)
    out = jax.block_until_ready(out)
    assert out.shape == (n_points, DIM_OUT), out.shape

    ref = sphere_init_vanilla_mlp_ref(x, params)
    err = float(jnp.max(jnp.abs(out - ref)))
    assert err < 2e-5, f"mismatch vs reference: {err}"

    print("KERNEL_OK")
</pallas_src>

<mosaic_0001>
module attributes {stable_mosaic.version = 11 : i64} {
  func.func @_mlp_kernel(%arg0: i32, %arg1: memref<256x16xf32, #tpu.memory_space<vmem>>, %arg2: memref<16x64xf32, #tpu.memory_space<vmem>>, %arg3: memref<1x64xf32, #tpu.memory_space<vmem>>, %arg4: memref<64x64xf32, #tpu.memory_space<vmem>>, %arg5: memref<1x64xf32, #tpu.memory_space<vmem>>, %arg6: memref<64x128xf32, #tpu.memory_space<vmem>>, %arg7: memref<1x128xf32, #tpu.memory_space<vmem>>, %arg8: memref<256x128xf32, #tpu.memory_space<vmem>>) attributes {dimension_semantics = [#tpu.dimension_semantics<parallel>], iteration_bounds = array<i64: 2>, scalar_prefetch = 0 : i64, scratch_operands = 0 : i64, tpu.core_type = #tpu.core_type<tc>, window_params = [{transform_indices = @transform_0, window_bounds = array<i64: 256, 16>}, {pipeline_mode = #tpu.pipeline_mode<synchronous>, transform_indices = @transform_1, window_bounds = array<i64: 16, 64>}, {pipeline_mode = #tpu.pipeline_mode<synchronous>, transform_indices = @transform_2, window_bounds = array<i64: 1, 64>}, {pipeline_mode = #tpu.pipeline_mode<synchronous>, transform_indices = @transform_3, window_bounds = array<i64: 64, 64>}, {pipeline_mode = #tpu.pipeline_mode<synchronous>, transform_indices = @transform_4, window_bounds = array<i64: 1, 64>}, {pipeline_mode = #tpu.pipeline_mode<synchronous>, transform_indices = @transform_5, window_bounds = array<i64: 64, 128>}, {pipeline_mode = #tpu.pipeline_mode<synchronous>, transform_indices = @transform_6, window_bounds = array<i64: 1, 128>}, {transform_indices = @transform_7, window_bounds = array<i64: 256, 128>}]} {
    %c0 = arith.constant 0 : index
    %c0_0 = arith.constant 0 : index
    %0 = vector.load %arg1[%c0, %c0_0] : memref<256x16xf32, #tpu.memory_space<vmem>>, vector<256x16xf32>
    %c0_1 = arith.constant 0 : index
    %c0_2 = arith.constant 0 : index
    %1 = vector.load %arg2[%c0_1, %c0_2] : memref<16x64xf32, #tpu.memory_space<vmem>>, vector<16x64xf32>
    %c0_3 = arith.constant 0 : index
    %c0_4 = arith.constant 0 : index
    %2 = vector.load %arg3[%c0_3, %c0_4] : memref<1x64xf32, #tpu.memory_space<vmem>>, vector<1x64xf32>
    %cst = arith.constant dense<0.000000e+00> : vector<256x64xf32>
    %3 = tpu.matmul %0, %1, %cst {dimension_numbers = #tpu.dot_dimension_numbers<[1], [0], [0], [1], [0, 0, 1, 1], [], []>} : vector<256x16xf32>, vector<16x64xf32>, vector<256x64xf32> -> vector<256x64xf32>
    %4 = vector.broadcast %2 : vector<1x64xf32> to vector<256x64xf32>
    %5 = arith.addf %3, %4 : vector<256x64xf32>
    %cst_5 = arith.constant 1.000000e+02 : f32
    %6 = vector.broadcast %cst_5 : f32 to vector<256x64xf32>
    %7 = arith.mulf %6, %5 : vector<256x64xf32>
    %cst_6 = arith.constant 2.000000e+01 : f32
    %8 = vector.broadcast %cst_6 : f32 to vector<256x64xf32>
    %9 = arith.minimumf %7, %8 : vector<256x64xf32>
    %10 = math.exp %9 : vector<256x64xf32>
    %11 = math.log1p %10 : vector<256x64xf32>
    %cst_7 = arith.constant 1.000000e+02 : f32
    %12 = vector.broadcast %cst_7 : f32 to vector<256x64xf32>
    %13 = arith.divf %11, %12 : vector<256x64xf32>
    %cst_8 = arith.constant 2.000000e+01 : f32
    %14 = vector.broadcast %cst_8 : f32 to vector<256x64xf32>
    %15 = arith.cmpf ogt, %7, %14 : vector<256x64xf32>
    %16 = arith.select %15, %5, %13 : vector<256x64xi1>, vector<256x64xf32>
    %c0_9 = arith.constant 0 : index
    %c0_10 = arith.constant 0 : index
    %17 = vector.load %arg4[%c0_9, %c0_10] : memref<64x64xf32, #tpu.memory_space<vmem>>, vector<64x64xf32>
    %c0_11 = arith.constant 0 : index
    %c0_12 = arith.constant 0 : index
    %18 = vector.load %arg5[%c0_11, %c0_12] : memref<1x64xf32, #tpu.memory_space<vmem>>, vector<1x64xf32>
    %cst_13 = arith.constant dense<0.000000e+00> : vector<256x64xf32>
    %19 = tpu.matmul %16, %17, %cst_13 {dimension_numbers = #tpu.dot_dimension_numbers<[1], [0], [0], [1], [0, 0, 1, 1], [], []>} : vector<256x64xf32>, vector<64x64xf32>, vector<256x64xf32> -> vector<256x64xf32>
    %20 = vector.broadcast %18 : vector<1x64xf32> to vector<256x64xf32>
    %21 = arith.addf %19, %20 : vector<256x64xf32>
    %cst_14 = arith.constant 1.000000e+02 : f32
    %22 = vector.broadcast %cst_14 : f32 to vector<256x64xf32>
    %23 = arith.mulf %22, %21 : vector<256x64xf32>
    %cst_15 = arith.constant 2.000000e+01 : f32
    %24 = vector.broadcast %cst_15 : f32 to vector<256x64xf32>
    %25 = arith.minimumf %23, %24 : vector<256x64xf32>
    %26 = math.exp %25 : vector<256x64xf32>
    %27 = math.log1p %26 : vector<256x64xf32>
    %cst_16 = arith.constant 1.000000e+02 : f32
    %28 = vector.broadcast %cst_16 : f32 to vector<256x64xf32>
    %29 = arith.divf %27, %28 : vector<256x64xf32>
    %cst_17 = arith.constant 2.000000e+01 : f32
    %30 = vector.broadcast %cst_17 : f32 to vector<256x64xf32>
    %31 = arith.cmpf ogt, %23, %30 : vector<256x64xf32>
    %32 = arith.select %31, %21, %29 : vector<256x64xi1>, vector<256x64xf32>
    %c0_18 = arith.constant 0 : index
    %c0_19 = arith.constant 0 : index
    %33 = vector.load %arg6[%c0_18, %c0_19] : memref<64x128xf32, #tpu.memory_space<vmem>>, vector<64x128xf32>
    %c0_20 = arith.constant 0 : index
    %c0_21 = arith.constant 0 : index
    %34 = vector.load %arg7[%c0_20, %c0_21] : memref<1x128xf32, #tpu.memory_space<vmem>>, vector<1x128xf32>
    %cst_22 = arith.constant dense<0.000000e+00> : vector<256x128xf32>
    %35 = tpu.matmul %32, %33, %cst_22 {dimension_numbers = #tpu.dot_dimension_numbers<[1], [0], [0], [1], [0, 0, 1, 1], [], []>} : vector<256x64xf32>, vector<64x128xf32>, vector<256x128xf32> -> vector<256x128xf32>
    %36 = vector.broadcast %34 : vector<1x128xf32> to vector<256x128xf32>
    %37 = arith.addf %35, %36 : vector<256x128xf32>
    %c0_23 = arith.constant 0 : index
    %c0_24 = arith.constant 0 : index
    %38 = vector.load %arg8[%c0_23, %c0_24] : memref<256x128xf32, #tpu.memory_space<vmem>>, vector<256x128xf32>
    tpu.vector_store %arg8[%c0_23, %c0_24], %37 {strides = array<i32>} : memref<256x128xf32, #tpu.memory_space<vmem>>, vector<256x128xf32>,
    return
  }
  func.func @transform_0(%arg0: i32) -> (i32, i32) {
    %c0_i32 = arith.constant 0 : i32
    %c0_i32_0 = arith.constant 0 : i32
    return %arg0, %c0_i32 : i32, i32
  }
  func.func @transform_1(%arg0: i32) -> (i32, i32) {
    %c0_i32 = arith.constant 0 : i32
    %c0_i32_0 = arith.constant 0 : i32
    %c0_i32_1 = arith.constant 0 : i32
    return %c0_i32, %c0_i32_0 : i32, i32
  }
  func.func @transform_2(%arg0: i32) -> (i32, i32) {
    %c0_i32 = arith.constant 0 : i32
    %c0_i32_0 = arith.constant 0 : i32
    %c0_i32_1 = arith.constant 0 : i32
    return %c0_i32, %c0_i32_0 : i32, i32
  }
  func.func @transform_3(%arg0: i32) -> (i32, i32) {
    %c0_i32 = arith.constant 0 : i32
    %c0_i32_0 = arith.constant 0 : i32
    %c0_i32_1 = arith.constant 0 : i32
    return %c0_i32, %c0_i32_0 : i32, i32
  }
  func.func @transform_4(%arg0: i32) -> (i32, i32) {
    %c0_i32 = arith.constant 0 : i32
    %c0_i32_0 = arith.constant 0 : i32
    %c0_i32_1 = arith.constant 0 : i32
    return %c0_i32, %c0_i32_0 : i32, i32
  }
  func.func @transform_5(%arg0: i32) -> (i32, i32) {
    %c0_i32 = arith.constant 0 : i32
    %c0_i32_0 = arith.constant 0 : i32
    %c0_i32_1 = arith.constant 0 : i32
    return %c0_i32, %c0_i32_0 : i32, i32
  }
  func.func @transform_6(%arg0: i32) -> (i32, i32) {
    %c0_i32 = arith.constant 0 : i32
    %c0_i32_0 = arith.constant 0 : i32
    %c0_i32_1 = arith.constant 0 : i32
    return %c0_i32, %c0_i32_0 : i32, i32
  }
  func.func @transform_7(%arg0: i32) -> (i32, i32) {
    %c0_i32 = arith.constant 0 : i32
    %c0_i32_0 = arith.constant 0 : i32
    return %arg0, %c0_i32 : i32, i32
  }
}

</mosaic_0001>

<bundles_post_ra>
// kernel: sphere_init_vanilla_mlp.1
= control target key start
LH: loop header
LB: loop body
LE: loop exit
PB: predicated region body
PF: predicated region fallthrough
CT: control target
= control target key end

     0   :  { %s3151_s24 = smov 0   ;;  %s4718_s0 = inlined_call_operand.vmem [shape: f32[512,16], index: 0, kind: input, shape index: {}]   ;;  %s4719_s1 = inlined_call_operand.vmem [shape: f32[16,64], index: 1, kind: input, shape index: {}]   ;;  %s4720_s2 = inlined_call_operand.vmem [shape: f32[1,64], index: 2, kind: input, shape index: {}]   ;;  %s4721_s3 = inlined_call_operand.vmem [shape: f32[64,64], index: 3, kind: input, shape index: {}]   ;;  %s4722_s4 = inlined_call_operand.vmem [shape: f32[1,64], index: 4, kind: input, shape index: {}]   ;;  %s4723_s5 = inlined_call_operand.vmem [shape: f32[64,128], index: 5, kind: input, shape index: {}]   ;;  %s4724_s6 = inlined_call_operand.vmem [shape: f32[1,128], index: 6, kind: input, shape index: {}]   ;;  %s4725_s7 = inlined_call_operand.vmem [shape: f32[512,128], index: 7, kind: output, shape index: {}]  }
   0x1 LB: > { %s2431_s25 = sadd.s32 4294967295, %s3109_s24   ;;  %p2435_p0 = scmp.ge.s32.totalorder %s3109_s24, 1  ;;  %s3109_s24 = sphi %s3151_s24, %s17_s24  }
   0x2   : > { %p238_p1 = scmp.lt.s32.totalorder %s3109_s24, 3 }
   0x4   : > { %p239_p2 = pnand %p2435_p0, %p238_p1 }
   0x6   : > { %242 = sbr.rel (%p239_p2) target bundleno = 824 (0x338), region = 48 }
   0xb   : > { %v315_v0 = vld [vmem:[%s4719_s1 + $0x8] sm:$0xff]  ;;  %v314_v1 = vld [vmem:[%s4719_s1] sm:$0xff]  ;;  %s2436_s30 = sshll.u32 %s2431_s25, 5  ;;  %vm323_vm0 = vcmask 130048   ;;  %v1165_v34 = vld [vmem:[%s4721_s3 + $0x38] sm:$0xff]  ;;  %vm1173_vm4 = vcmask 523264  }
   0xc   : > { %2655 = vmatprep.subr.mxu0 %v315_v0  ;;  %2835 = vmatprep.subr.mxu1 %v315_v0  ;;  %p271_p3 = scmp.lt.s32.totalorder %s2436_s30, 63  ;;  %v1164_v35 = vld [vmem:[%s4721_s3 + $0x30] sm:$0xff]  ;;  %v1163_v36 = vld [vmem:[%s4721_s3 + $0x28] sm:$0xff]  ;;  %v1162_v37 = vld [vmem:[%s4721_s3 + $0x20] sm:$0xff] }
   0xd   : > { %2656 = vmatpush3.msra.mxu0 %v315_v0  ;;  %2837 = vmatpush3.msra.mxu1 %v315_v0  ;;  %v1161_v38 = vld [vmem:[%s4721_s3 + $0x18] sm:$0xff]  ;;  %v1160_v39 = vld [vmem:[%s4721_s3 + $0x10] sm:$0xff]  ;;  %v1159_v40 = vld [vmem:[%s4721_s3 + $0x8] sm:$0xff] }
   0xe   : > { %2657 = vmatprep.subr.mxu0 %v314_v1  ;;  %2836 = vmatprep.subr.mxu1 %v314_v1  ;;  %s5021_s30 = smov (!%p271_p3, %s2436_s30), 63  ;;  %v1158_v41 = vld [vmem:[%s4721_s3] sm:$0xff] }
   0xf   : > { %2658 = vmatpush3.msra.mxu0 %v314_v1  ;;  %2838 = vmatpush3.msra.mxu1 %v314_v1  ;;  %s2437_s8 = sshll.u32 %s5021_s30, 3  ;;  %v3266_v42 = vld [vmem:[%s4720_s2] ss:$0 sm:$0xff] }
  0x10   : > { %s3173_s11 = scalar_lea.vmem %s4718_s0, %s2437_s8  ;;  %2707 = vmatprep.subr.mxu1 %v1165_v34  ;;  %s4649_s12 = scalar_lea.vmem %s4725_s7, %s2437_s8 }
  0x11   : > { %v282_v2 = vld [vmem:[%s3173_s11] sm:$0xff]  ;;  %v283_v4 = vld [vmem:[%s3173_s11 + $0x8] sm:$0xff]  ;;  %v284_v6 = vld [vmem:[%s3173_s11 + $0x10] sm:$0xff] }
  0x12   : > { %v298_v3 = vld [vmem:[%s3173_s11 + $0x80] sm:$0xff]  ;;  %2659 = vmatprep.mubr.msk.f32.mxu0 %vm323_vm0, %v282_v2  ;;  %v299_v5 = vld [vmem:[%s3173_s11 + $0x88] sm:$0xff]  ;;  %v300_v7 = vld [vmem:[%s3173_s11 + $0x90] sm:$0xff] }
  0x13   : > { %2683 = vmatprep.mubr.msk.f32.mxu1 %vm323_vm0, %v298_v3  ;;  %2660 = vmatmul.mubr.msk.f32.vlgmr.msra.gmra.mxu0 %vm323_vm0, %v283_v4  ;;  %v285_v8 = vld [vmem:[%s3173_s11 + $0x18] sm:$0xff]  ;;  %v286_v10 = vld [vmem:[%s3173_s11 + $0x20] sm:$0xff]  ;;  %v287_v12 = vld [vmem:[%s3173_s11 + $0x28] sm:$0xff] }
  0x14   : > { %2684 = vmatmul.mubr.msk.f32.vlgmr.msra.gmra.mxu1 %vm323_vm0, %v299_v5  ;;  %2662 = vmatprep.mubr.msk.f32.mxu0 %vm323_vm0, %v284_v6  ;;  %v301_v9 = vld [vmem:[%s3173_s11 + $0x98] sm:$0xff]  ;;  %v302_v11 = vld [vmem:[%s3173_s11 + $0xa0] sm:$0xff]  ;;  %v303_v13 = vld [vmem:[%s3173_s11 + $0xa8] sm:$0xff] }
  0x15   : > { %2686 = vmatprep.mubr.msk.f32.mxu1 %vm323_vm0, %v300_v7  ;;  %v288_v14 = vld [vmem:[%s3173_s11 + $0x30] sm:$0xff]  ;;  %v289_v16 = vld [vmem:[%s3173_s11 + $0x38] sm:$0xff]  ;;  %v290_v18 = vld [vmem:[%s3173_s11 + $0x40] sm:$0xff]  ;;  %2708 = vmatpush3.msra.mxu1 %v1165_v34 }
  0x16   : > { %v304_v15 = vld [vmem:[%s3173_s11 + $0xb0] sm:$0xff]  ;;  %v305_v17 = vld [vmem:[%s3173_s11 + $0xb8] sm:$0xff]  ;;  %v306_v19 = vld [vmem:[%s3173_s11 + $0xc0] sm:$0xff]  ;;  %2709 = vmatprep.subr.mxu1 %v1164_v35 }
  0x17   : > { %2663 = vmatmul.mubr.msk.f32.gmra.mxu0 %vm323_vm0, %v285_v8  ;;  %v291_v20 = vld [vmem:[%s3173_s11 + $0x48] sm:$0xff]  ;;  %v292_v22 = vld [vmem:[%s3173_s11 + $0x50] sm:$0xff]  ;;  %v293_v24 = vld [vmem:[%s3173_s11 + $0x58] sm:$0xff]  ;;  %2710 = vmatpush3.msra.mxu1 %v1164_v35 }
  0x18   : > { %2687 = vmatmul.mubr.msk.f32.gmra.mxu1 %vm323_vm0, %v301_v9  ;;  %2665 = vmatprep.mubr.msk.f32.mxu0 %vm323_vm0, %v286_v10  ;;  %v307_v21 = vld [vmem:[%s3173_s11 + $0xc8] sm:$0xff]  ;;  %v308_v23 = vld [vmem:[%s3173_s11 + $0xd0] sm:$0xff]  ;;  %v309_v25 = vld [vmem:[%s3173_s11 + $0xd8] sm:$0xff] }
  0x19   : > { %2689 = vmatprep.mubr.msk.f32.mxu1 %vm323_vm0, %v302_v11  ;;  %v294_v26 = vld [vmem:[%s3173_s11 + $0x60] sm:$0xff]  ;;  %v295_v28 = vld [vmem:[%s3173_s11 + $0x68] sm:$0xff]  ;;  %v296_v30 = vld [vmem:[%s3173_s11 + $0x70] sm:$0xff]  ;;  %2711 = vmatprep.subr.mxu1 %v1163_v36 }
  0x1a   : > { %v310_v27 = vld [vmem:[%s3173_s11 + $0xe0] sm:$0xff]  ;;  %v311_v29 = vld [vmem:[%s3173_s11 + $0xe8] sm:$0xff]  ;;  %v312_v31 = vld [vmem:[%s3173_s11 + $0xf0] sm:$0xff]  ;;  %2712 = vmatpush3.msra.mxu1 %v1163_v36 }
  0x1b   : > { %2666 = vmatmul.mubr.msk.f32.gmra.mxu0 %vm323_vm0, %v287_v12  ;;  %v297_v32 = vld [vmem:[%s3173_s11 + $0x78] sm:$0xff]  ;;  %2713 = vmatprep.subr.mxu1 %v1162_v37 }
  0x1c   : > { %2690 = vmatmul.mubr.msk.f32.gmra.mxu1 %vm323_vm0, %v303_v13  ;;  %2668 = vmatprep.mubr.msk.f32.mxu0 %vm323_vm0, %v288_v14  ;;  %v313_v33 = vld [vmem:[%s3173_s11 + $0xf8] sm:$0xff] }
  0x1d   : > { %2692 = vmatprep.mubr.msk.f32.mxu1 %vm323_vm0, %v304_v15  ;;  %2714 = vmatpush3.msra.mxu1 %v1162_v37 }
  0x1e   : > { %2715 = vmatprep.subr.mxu1 %v1161_v38 }
  0x1f   : > { %2669 = vmatmul.mubr.msk.f32.gmra.mxu0 %vm323_vm0, %v289_v16  ;;  %2716 = vmatpush3.msra.mxu1 %v1161_v38 }
  0x20   : > { %2693 = vmatmul.mubr.msk.f32.gmra.mxu1 %vm323_vm0, %v305_v17  ;;  %2671 = vmatprep.mubr.msk.f32.mxu0 %vm323_vm0, %v290_v18 }
  0x21   : > { %2695 = vmatprep.mubr.msk.f32.mxu1 %vm323_vm0, %v306_v19  ;;  %2717 = vmatprep.subr.mxu1 %v1160_v39 }
  0x22   : > { %2718 = vmatpush3.msra.mxu1 %v1160_v39 }
  0x23   : > { %2672 = vmatmul.mubr.msk.f32.gmra.mxu0 %vm323_vm0, %v291_v20  ;;  %2719 = vmatprep.subr.mxu1 %v1159_v40 }
  0x24   : > { %2696 = vmatmul.mubr.msk.f32.gmra.mxu1 %vm323_vm0, %v307_v21  ;;  %2674 = vmatprep.mubr.msk.f32.mxu0 %vm323_vm0, %v292_v22 }
  0x25   : > { %2698 = vmatprep.mubr.msk.f32.mxu1 %vm323_vm0, %v308_v23  ;;  %2720 = vmatpush3.msra.mxu1 %v1159_v40 }
  0x26   : > { %2721 = vmatprep.subr.mxu1 %v1158_v41 }
  0x27   : > { %2675 = vmatmul.mubr.msk.f32.gmra.mxu0 %vm323_vm0, %v293_v24  ;;  %2722 = vmatpush3.msra.mxu1 %v1158_v41 }
  0x28   : > { %2699 = vmatmul.mubr.msk.f32.gmra.mxu1 %vm323_vm0, %v309_v25  ;;  %2677 = vmatprep.mubr.msk.f32.mxu0 %vm323_vm0, %v294_v26 }
  0x29   : > { %2701 = vmatprep.mubr.msk.f32.mxu1 %vm323_vm0, %v310_v27 }
  0x2b   : > { %2678 = vmatmul.mubr.msk.f32.gmra.mxu0 %vm323_vm0, %v295_v28 }
  0x2c   : > { %2702 = vmatmul.mubr.msk.f32.gmra.mxu1 %vm323_vm0, %v311_v29  ;;  %2680 = vmatprep.mubr.msk.f32.mxu0 %vm323_vm0, %v296_v30 }
  0x2d   : > { %2704 = vmatprep.mubr.msk.f32.mxu1 %vm323_vm0, %v312_v31 }
  0x2f   : > { %2681 = vmatmul.mubr.msk.f32.gmra.mxu0 %vm323_vm0, %v297_v32 }
  0x30   : > { %2705 = vmatmul.mubr.msk.f32.gmra.mxu1 %vm323_vm0, %v313_v33 }
  0xd3   : > { %v2661_v43 = vpop.f32.mrf.mxu0 }
  0xd4   : > { %v2685_v44 = vpop.f32.mrf.mxu1  ;;  %v3269_v45 = vadd.f32 %v2661_v43, %v3266_v42 }
  0xd5   : > { %v486_v46 = vpop.f32.mrf.mxu0  ;;  %v3276_v52 = vadd.f32 %v2685_v44, %v3266_v42 }
  0xd6   : > { %v566_v47 = vpop.f32.mrf.mxu1  ;;  %v3272_v48 = vmul.f32 100.0, %v3269_v45  ;;  %v3279_v53 = vadd.f32 %v3266_v42, %v486_v46 }
  0xd7   : > { %v2664_v49 = vpop.f32.mrf.mxu0  ;;  %4804 = vst [vmem:[#allocation2_spill] sm:$0xff] %v3276_v52  ;;  %v3282_v57 = vadd.f32 %v3266_v42, %v566_v47  ;;  %v3285_v60 = vmul.f32 100.0, %v3276_v52 }
  0xd8   : > { %v2688_v50 = vpop.f32.mrf.mxu1  ;;  %v678_v51 = vmin.f32 %v3272_v48, 20.0  ;;  %v3288_v61 = vadd.f32 %v2664_v49, %v3266_v42  ;;  %v3291_v62 = vmul.f32 100.0, %v3279_v53  ;;  %vm1095_vm2 = vcmp.gt.f32.partialorder %v3272_v48, 20.0 }
  0xd9   : > { %v496_v54 = vpop.f32.mrf.mxu0  ;;  %4805 = vst [vmem:[#allocation3_spill] sm:$0xff] %v3282_v57  ;;  %4806 = vst [vmem:[#allocation4_spill] sm:$0xff] %v3285_v60  ;;  %v3294_v63 = vadd.f32 %v2688_v50, %v3266_v42  ;;  %v3300_v3 = vmul.f32 100.0, %v3282_v57  ;;  %v694_v7 = vmin.f32 %v3285_v60, 20.0 }
  0xda   : > { %v576_v55 = vpop.f32.mrf.mxu1  ;;  %v711_v56 = vmul.f32 1.442695, %v678_v51  ;;  %v3297_v2 = vadd.f32 %v3266_v42, %v496_v54  ;;  %v3307_v8 = vmul.f32 100.0, %v3288_v61  ;;  %v677_v9 = vmin.f32 %v3291_v62, 20.0 }
  0xdb   : > { %v2667_v58 = vpop.f32.mrf.mxu0  ;;  %4807 = vst [vmem:[#allocation5_spill] sm:$0xff] %v3294_v63  ;;  %4808 = vst [vmem:[#allocation6_spill] sm:$0xff] %v3300_v3  ;;  %v3303_v4 = vadd.f32 %v3266_v42, %v576_v55  ;;  %v3311_v10 = vmul.f32 100.0, %v3294_v63  ;;  %v693_v15 = vmin.f32 %v3300_v3, 20.0  ;;  %v743_v19 = vmul.f32 1.442695, %v694_v7 }
  0xdc   : > { %v2691_v59 = vpop.f32.mrf.mxu1  ;;  %2847 = vpow2.f32 %v711_v56  ;;  %v3314_v13 = vmul.f32 100.0, %v3297_v2  ;;  %v3317_v14 = vadd.f32 %v2667_v58, %v3266_v42  ;;  %v680_v20 = vmin.f32 %v3307_v8, 20.0 }
  0xdd   : > { %v506_v0 = vpop.f32.mrf.mxu0  ;;  %4809 = vst [vmem:[#allocation7_spill] sm:$0xff] %v3303_v4  ;;  %4810 = vst [vmem:[#allocation8_spill] sm:$0xff] %v3311_v10  ;;  %v3321_v16 = vmul.f32 100.0, %v3303_v4  ;;  %v3324_v17 = vadd.f32 %v2691_v59, %v3266_v42  ;;  %v709_v22 = vmul.f32 1.442695, %v677_v9  ;;  %v696_v23 = vmin.f32 %v3311_v10, 20.0 }
  0xde   : > { %v586_v1 = vpop.f32.mrf.mxu1  ;;  %v3328_v21 = vadd.f32 %v3266_v42, %v506_v0  ;;  %v679_v26 = vmin.f32 %v3314_v13, 20.0  ;;  %v3336_v27 = vmul.f32 100.0, %v3317_v14  ;;  %v741_v29 = vmul.f32 1.442695, %v693_v15 }
  0xdf   : > { %v2670_v5 = vpop.f32.mrf.mxu0  ;;  %4811 = vst [vmem:[#allocation9_spill] sm:$0xff] %v3321_v16  ;;  %4812 = vst [vmem:[#allocation10_spill] sm:$0xff] %v3324_v17  ;;  %v3332_v24 = vadd.f32 %v3266_v42, %v586_v1  ;;  %v695_v30 = vmin.f32 %v3321_v16, 20.0  ;;  %v3340_v31 = vmul.f32 100.0, %v3324_v17  ;;  %2849 = vpow2.f32 %v743_v19 }
  0xe0   : > { %v2694_v6 = vpop.f32.mrf.mxu1  ;;  %v715_v32 = vmul.f32 1.442695, %v680_v20  ;;  %v3343_v33 = vmul.f32 100.0, %v3328_v21  ;;  %v3346_v34 = vadd.f32 %v2670_v5, %v3266_v42  ;;  %2851 = vpow2.f32 %v709_v22 }
  0xe1   : > { %v516_v11 = vpop.f32.mrf.mxu0  ;;  %4813 = vst [vmem:[#allocation11_spill] sm:$0xff] %v3332_v24  ;;  %4814 = vst [vmem:[#allocation12_spill] sm:$0xff] %v3340_v31  ;;  %v747_v35 = vmul.f32 1.442695, %v696_v23  ;;  %v3349_v36 = vmul.f32 100.0, %v3332_v24  ;;  %v682_v40 = vmin.f32 %v3336_v27, 20.0  ;;  %v3355_v41 = vadd.f32 %v2694_v6, %v3266_v42 }
  0xe2   : > { %v596_v12 = vpop.f32.mrf.mxu1  ;;  %v713_v39 = vmul.f32 1.442695, %v679_v26  ;;  %v3358_v43 = vadd.f32 %v3266_v42, %v516_v11  ;;  %2853 = vpow2.f32 %v741_v29  ;;  %v745_v46 = vmul.f32 1.442695, %v695_v30 }
  0xe3   : > { %v2673_v18 = vpop.f32.mrf.mxu0  ;;  %4815 = vst [vmem:[#allocation13_spill] sm:$0xff] %v3349_v36  ;;  %4816 = vst [vmem:[#allocation14_spill] sm:$0xff] %v3355_v41  ;;  %v698_v47 = vmin.f32 %v3340_v31, 20.0  ;;  %2855 = vpow2.f32 %v715_v32  ;;  %v681_v49 = vmin.f32 %v3343_v33, 20.0  ;;  %v3363_v50 = vmul.f32 100.0, %v3346_v34 }
  0xe4   : > { %v2697_v25 = vpop.f32.mrf.mxu1  ;;  %v3366_v51 = vadd.f32 %v3266_v42, %v596_v12  ;;  %2857 = vpow2.f32 %v747_v35  ;;  %v697_v55 = vmin.f32 %v3349_v36, 20.0  ;;  %v719_v58 = vmul.f32 1.442695, %v682_v40 }
  0xe5   : > { %v526_v28 = vpop.f32.mrf.mxu0  ;;  %2859 = vpow2.f32 %v713_v39  ;;  %v3371_v59 = vmul.f32 100.0, %v3355_v41  ;;  %v3374_v0 = vmul.f32 100.0, %v3358_v43  ;;  %v751_v5 = vmul.f32 1.442695, %v698_v47 }
  0xe6   : > { %v606_v37 = vpop.f32.mrf.mxu1  ;;  %4817 = vst [vmem:[#allocation15_spill] sm:$0xff] %v3366_v51  ;;  %2861 = vpow2.f32 %v745_v46  ;;  %v3377_v6 = vadd.f32 %v2673_v18, %v3266_v42  ;;  %v3380_v7 = vadd.f32 %v2697_v25, %v3266_v42  ;;  %v717_v9 = vmul.f32 1.442695, %v681_v49 }
  0xe7   : > { %v2676_v44 = vpop.f32.mrf.mxu0  ;;  %4818 = vst [vmem:[#allocation16_spill] sm:$0xff] %v3371_v59  ;;  %v684_v11 = vmin.f32 %v3363_v50, 20.0  ;;  %v3384_v12 = vmul.f32 100.0, %v3366_v51  ;;  %v3387_v15 = vadd.f32 %v3266_v42, %v526_v28  ;;  %v749_v19 = vmul.f32 1.442695, %v697_v55 }
  0xe8   : > { %v2700_v56 = vpop.f32.mrf.mxu1  ;;  %4819 = vst [vmem:[#allocation17_spill] sm:$0xff] %v3380_v7  ;;  %v3390_v20 = vmul.f32 100.0, %v3377_v6  ;;  %v3393_v18 = vadd.f32 %v3266_v42, %v606_v37  ;;  %v700_v23 = vmin.f32 %v3371_v59, 20.0  ;;  %v683_v25 = vmin.f32 %v3374_v0, 20.0 }
  0xe9   : > { %v3351_v38 = vpop.eup %2847  ;;  %v536_v1 = vpop.f32.mrf.mxu0  ;;  %4820 = vst [vmem:[#allocation18_spill] sm:$0xff] %v3384_v12  ;;  %v3398_v26 = vmul.f32 100.0, %v3380_v7  ;;  %v3401_v28 = vmul.f32 100.0, %v3387_v15  ;;  %v3404_v30 = vadd.f32 %v2676_v44, %v3266_v42  ;;  %v723_v32 = vmul.f32 1.442695, %v684_v11 }
  0xea   : > { %v782_v54 = vadd.f32 1.0, %v3351_v38  ;;  %4821 = vst [vmem:[#allocation19_spill] sm:$0xff] %v3393_v18  ;;  %v616_v22 = vpop.f32.mrf.mxu1  ;;  %v699_v35 = vmin.f32 %v3384_v12, 20.0  ;;  %v3408_v37 = vadd.f32 %v2700_v56, %v3266_v42  ;;  %v686_v40 = vmin.f32 %v3390_v20, 20.0 }
  0xeb   : > { %4822 = vst [vmem:[#allocation20_spill] sm:$0xff] %v3398_v26  ;;  %v2679_v29 = vpop.f32.mrf.mxu0  ;;  %4823 = vst [vmem:[#allocation21_spill] sm:$0xff] %v3404_v30  ;;  %v3414_v46 = vmul.f32 100.0, %v3393_v18  ;;  %v755_v44 = vmul.f32 1.442695, %v700_v23  ;;  %v702_v55 = vmin.f32 %v3398_v26, 20.0  ;;  %v3427_v11 = vadd.f32 %v3266_v42, %v616_v22 }
  0xec   : > { %2863 = vlog2.f32 %v782_v54  ;;  %4824 = vst [vmem:[#allocation22_spill] sm:$0xff] %v3408_v37  ;;  %v3410_v39 = vpop.eup %2849  ;;  %v2703_v47 = vpop.f32.mrf.mxu1  ;;  %v721_v54 = vmul.f32 1.442695, %v683_v25  ;;  %v753_v23 = vmul.f32 1.442695, %v699_v35  ;;  %v3435_v25 = vmul.f32 100.0, %v3408_v37 }
  0xed   : > { %2865 = vpow2.f32 %v719_v58  ;;  %4825 = vst [vmem:[#allocation23_spill] sm:$0xff] %v3414_v46  ;;  %v3416_v49 = vpop.eup %2851  ;;  %v3420_v58 = vadd.f32 %v3266_v42, %v536_v1  ;;  %v546_v56 = vpop.f32.mrf.mxu0  ;;  %4826 = vst [vmem:[#allocation24_spill] sm:$0xff] %v3427_v11  ;;  %v727_v26 = vmul.f32 1.442695, %v686_v40  ;;  %v701_v18 = vmin.f32 %v3414_v46, 20.0 }
  0xee   : > { %2867 = vpow2.f32 %v751_v5  ;;  %v685_v5 = vmin.f32 %v3401_v28, 20.0  ;;  %4828 = vst [vmem:[#allocation26_spill] sm:$0xff] %v3435_v25  ;;  %v3444_v22 = vadd.f32 %v2703_v47, %v3266_v42  ;;  %v759_v35 = vmul.f32 1.442695, %v702_v55 }
  0xef   : > { %2869 = vpow2.f32 %v717_v9  ;;  %v3424_v9 = vmul.f32 100.0, %v3404_v30  ;;  %v3432_v7 = vpop.eup %2853  ;;  %v3441_v41 = vmul.f32 100.0, %v3420_v58  ;;  %v3450_v37 = vmul.f32 100.0, %v3427_v11  ;;  %v2682_v51 = vpop.f32.mrf.mxu0 }
  0xf0   : > { %2871 = vpow2.f32 %v749_v19  ;;  %v3430_v19 = vadd.f32 %v2679_v29, %v3266_v42  ;;  %v3437_v1 = vpop.eup %2855  ;;  %4829 = vst [vmem:[#allocation27_spill] sm:$0xff] %v3444_v22  ;;  %v626_v29 = vpop.f32.mrf.mxu1  ;;  %v725_v46 = vmul.f32 1.442695, %v685_v5  ;;  %v788_v12 = vand.u32 2147483647, %v3351_v38 }
  0xf1   : > { %2873 = vpow2.f32 %v723_v32  ;;  %v3446_v59 = vpop.eup %2857  ;;  %v785_v32 = vmul.f32 -0.5, %v3351_v38  ;;  %4831 = vst [vmem:[#allocation29_spill] sm:$0xff] %v3450_v37  ;;  %v688_v17 = vmin.f32 %v3424_v9, 20.0  ;;  %v757_v55 = vmul.f32 1.442695, %v701_v18 }
  0xf2   : > { %4827 = vst [vmem:[#allocation25_spill] sm:$0xff] %v3430_v19  ;;  %4830 = vst [vmem:[#allocation28_spill] sm:$0xff] %v3446_v59  ;;  %2875 = vpow2.f32 %v755_v44  ;;  %v3452_v40 = vpop.eup %2859  ;;  %v3456_v47 = vmul.f32 100.0, %v3430_v19  ;;  %v704_v44 = vmin.f32 %v3435_v25, 20.0  ;;  %v687_v11 = vmin.f32 %v3441_v41, 20.0 }
  0xf3   : > { %2877 = vpow2.f32 %v721_v54  ;;  %v3458_v24 = vpop.eup %2861  ;;  %v3464_v63 = vmul.f32 100.0, %v3444_v22  ;;  %v2706_v54 = vpop.f32.mrf.mxu1  ;;  %v703_v4 = vmin.f32 %v3450_v37, 20.0  ;;  %v3468_v31 = vadd.f32 %v3266_v42, %v546_v56 }
  0xf4   : > { %4832 = vst [vmem:[#allocation30_spill] sm:$0xff] %v3458_v24  ;;  %2879 = vpow2.f32 %v753_v23  ;;  %v3471_v52 = vadd.f32 %v3266_v42, %v626_v29  ;;  %v556_v23 = vpop.f32.mrf.mxu0  ;;  %v786_v18 = vadd.f32 1.0, %v785_v32  ;;  %v690_v22 = vmin.f32 %v3456_v47, 20.0 }
  0xf5   : > { %2881 = vpow2.f32 %v727_v26  ;;  %4833 = vst [vmem:[#allocation31_spill] sm:$0xff] %v3464_v63  ;;  %4834 = vst [vmem:[#allocation32_spill] sm:$0xff] %v3468_v31  ;;  %v731_v26 = vmul.f32 1.442695, %v688_v17  ;;  %v763_v36 = vmul.f32 1.442695, %v704_v44  ;;  %v3485_v29 = vadd.f32 %v2682_v51, %v3266_v42  ;;  %v636_v16 = vpop.f32.mrf.mxu1 }
  0xf6   : > { %2883 = vpow2.f32 %v759_v35  ;;  %4835 = vst [vmem:[#allocation33_spill] sm:$0xff] %v3471_v52  ;;  %v3479_v35 = vmul.f32 100.0, %v3468_v31  ;;  %v3482_v56 = vmul.f32 100.0, %v3471_v52  ;;  %v729_v32 = vmul.f32 1.442695, %v687_v11 }
  0xf7   : > { %2885 = vpow2.f32 %v725_v46  ;;  %4838 = vst [vmem:[#allocation36_spill] sm:$0xff] %v3485_v29  ;;  %v706_v17 = vmin.f32 %v3464_v63, 20.0  ;;  %v3491_v46 = vadd.f32 %v3266_v42, %v556_v23  ;;  %v761_v60 = vmul.f32 1.442695, %v703_v4 }
  0xf8   : > { %4837 = vst [vmem:[#allocation35_spill] sm:$0xff] %v3482_v56  ;;  %2887 = vpow2.f32 %v757_v55  ;;  %v689_v52 = vmin.f32 %v3479_v35, 20.0  ;;  %v3497_v19 = vadd.f32 %v2706_v54, %v3266_v42  ;;  %v735_v51 = vmul.f32 1.442695, %v690_v22 }
  0xf9   : > { %v2864_v5 = vpop.eup %2863  ;;  %4839 = vst [vmem:[#allocation37_spill] sm:$0xff] %v3491_v46  ;;  %2889 = vpow2.f32 %v731_v26  ;;  %v3501_v11 = vmul.f32 100.0, %v3485_v29  ;;  %v3504_v23 = vmul.f32 100.0, %v3491_v46  ;;  %v3507_v63 = vadd.f32 %v3266_v42, %v636_v16 }
  0xfa   : > { %v3473_v25 = vpop.eup %2865  ;;  %v784_v10 = vmul.f32 0.6931472, %v2864_v5  ;;  %4841 = vst [vmem:[#allocation39_spill] sm:$0xff] %v3497_v19  ;;  %v705_v5 = vmin.f32 %v3482_v56, 20.0  ;;  %2891 = vpow2.f32 %v763_v36  ;;  %v773_v4 = vadd.f32 1.0, %v3416_v49 }
  0xfb   : > { %v3476_v57 = vpop.eup %2867  ;;  %4842 = vst [vmem:[#allocation40_spill] sm:$0xff] %v3501_v11  ;;  %4843 = vst [vmem:[#allocation41_spill] sm:$0xff] %v3504_v23  ;;  %v787_v54 = vmul.f32 %v3351_v38, %v786_v18  ;;  %2893 = vpow2.f32 %v729_v32  ;;  %v767_v22 = vmul.f32 1.442695, %v706_v17  ;;  %v692_v26 = vmin.f32 %v3501_v11, 20.0 }
  0xfc   : > { %4836 = vst [vmem:[#allocation34_spill] sm:$0xff] %v3476_v57  ;;  %v3487_v37 = vpop.eup %2869  ;;  %4844 = vst [vmem:[#allocation42_spill] sm:$0xff] %v3507_v63  ;;  %vm3514_vm1 = vcmp.lt.f32.partialorder %v788_v12, 0.0004427343  ;;  %2895 = vpow2.f32 %v761_v60  ;;  %v733_v36 = vmul.f32 1.442695, %v689_v52 }
  0xfd   : > { %v3493_v44 = vpop.eup %2871  ;;  %v3519_v29 = vmul.f32 100.0, %v3497_v19  ;;  %v790_v16 = vsel %vm3514_vm1, %v787_v54, %v784_v10  ;;  %2897 = vpow2.f32 %v735_v51  ;;  %v765_v38 = vmul.f32 1.442695, %v705_v5 }
  0xfe   : > { %4840 = vst [vmem:[#allocation38_spill] sm:$0xff] %v3493_v44  ;;  %v3510_v55 = vpop.eup %2873  ;;  %v739_v32 = vmul.f32 1.442695, %v692_v26  ;;  %v691_v12 = vmin.f32 %v3504_v23, 20.0  ;;  %v3529_v17 = vmul.f32 100.0, %v3507_v63  ;;  %2899 = vlog2.f32 %v773_v4 }
  0xff   : > { %4847 = vst [vmem:[#allocation43_spill] sm:$0xff] %v3519_v29  ;;  %v3521_v42 = vpop.eup %2875  ;;  %2901 = vpow2.f32 %v767_v22  ;;  %v791_v60 = vadd.f32 1.0, %v3452_v40  ;;  %v1063_v56 = vmul.f32 0.01, %v790_v16  ;;  %v708_v10 = vmin.f32 %v3519_v29, 20.0 }
 0x100   : > { %4848 = vst [vmem:[#allocation44_spill] sm:$0xff] %v3521_v42  ;;  %v3525_v18 = vpop.eup %2877  ;;  %4849 = vst [vmem:[#allocation45_spill] sm:$0xff] %v3529_v17  ;;  %2903 = vpow2.f32 %v733_v36  ;;  %v800_v51 = vadd.f32 1.0, %v3437_v1  ;;  %v776_v54 = vmul.f32 -0.5, %v3416_v49  ;;  %v794_v4 = vmul.f32 -0.5, %v3452_v40 }
 0x101   : > { %v3531_v52 = vpop.eup %2879  ;;  %2905 = vpow2.f32 %v765_v38  ;;  %v737_v22 = vmul.f32 1.442695, %v691_v12  ;;  %v707_v63 = vmin.f32 %v3529_v17, 20.0  ;;  %v779_v36 = vand.u32 2147483647, %v3416_v49 }
 0x102   : > { %4850 = vst [vmem:[#allocation46_spill] sm:$0xff] %v3531_v52  ;;  %v3534_v19 = vpop.eup %2881  ;;  %2907 = vpow2.f32 %v739_v32  ;;  %v809_v16 = vadd.f32 1.0, %v3487_v37  ;;  %v3549_v29 = vsel %vm1095_vm2, %v3269_v45, %v1063_v56  ;;  %v3551_v38 = vmul.f32 1.442695, %v708_v10 }
 0x103   : > { %v3538_v5 = vpop.eup %2883  ;;  %2909 = vlog2.f32 %v791_v60  ;;  %v777_v32 = vadd.f32 1.0, %v776_v54  ;;  %v795_v12 = vadd.f32 1.0, %v794_v4  ;;  %v818_v48 = vadd.f32 1.0, %v3473_v25 }
 0x104   : > { %4851 = vst [vmem:[#allocation47_spill] sm:$0xff] %v3538_v5  ;;  %v3542_v26 = vpop.eup %2885  ;;  %4852 = vst [vmem:[#allocation48_spill] sm:$0xff] %v3551_v38  ;;  %2911 = vlog2.f32 %v800_v51  ;;  %v803_v5 = vmul.f32 -0.5, %v3437_v1  ;;  %v3559_v60 = vmul.f32 1.442695, %v707_v63  ;;  %v827_v56 = vadd.f32 1.0, %v3525_v18 }
 0x105   : > { %v3554_v42 = vpop.eup %2887  ;;  %2913 = vlog2.f32 %v809_v16  ;;  %v797_v45 = vand.u32 2147483647, %v3452_v40  ;;  %vm3565_vm3 = vcmp.lt.f32.partialorder %v779_v36, 0.0004427343  ;;  %v806_v54 = vand.u32 2147483647, %v3437_v1 }
 0x106   : > { %4853 = vst [vmem:[#allocation49_spill] sm:$0xff] %v3554_v42  ;;  %v3557_v17 = vpop.eup %2889  ;;  %2915 = vpow2.f32 %v737_v22  ;;  %v812_v4 = vmul.f32 -0.5, %v3487_v37  ;;  %vm1094_vm5 = vcmp.gt.f32.partialorder %v3291_v62, 20.0  ;;  %v804_v63 = vadd.f32 1.0, %v803_v5 }
 0x107   : > { %v3563_v10 = vpop.eup %2891  ;;  %2917 = vlog2.f32 %v818_v48  ;;  %v821_v22 = vmul.f32 -0.5, %v3473_v25  ;;  %v778_v38 = vmul.f32 %v3416_v49, %v777_v32  ;;  %v3580_v42 = vmul.f32 %v3452_v40, %v795_v12 }
 0x108   : > { %4854 = vst [vmem:[#allocation50_spill] sm:$0xff] %v3563_v10  ;;  %v3571_v16 = vpop.eup %2893  ;;  %2919 = vlog2.f32 %v827_v56  ;;  %v836_v10 = vadd.f32 1.0, %v3510_v55  ;;  %v815_v46 = vand.u32 2147483647, %v3487_v37  ;;  %v830_v48 = vmul.f32 -0.5, %v3525_v18 }
 0x109   : > { %v3576_v36 = vpop.eup %2895  ;;  %vm3586_vm6 = vcmp.lt.f32.partialorder %v797_v45, 0.0004427343  ;;  %v824_v56 = vand.u32 2147483647, %v3473_v25  ;;  %v845_v49 = vadd.f32 1.0, %v3542_v26  ;;  %v813_v12 = vadd.f32 1.0, %v812_v4 }
 0x10a   : > { %4857 = vst [vmem:[#allocation51_spill] sm:$0xff] %v3576_v36  ;;  %v3584_v52 = vpop.eup %2897  ;;  %2921 = vlog2.f32 %v836_v10  ;;  %v839_v36 = vmul.f32 -0.5, %v3510_v55  ;;  %vm3593_vm7 = vcmp.lt.f32.partialorder %v806_v54, 0.0004427343  ;;  %v848_v57 = vmul.f32 -0.5, %v3542_v26 }
 0x10b   : > { %v2900_v32 = vpop.eup %2899  ;;  %v854_v45 = vadd.f32 1.0, %v3534_v19  ;;  %v805_v44 = vmul.f32 %v3437_v1, %v804_v63  ;;  %v822_v10 = vadd.f32 1.0, %v821_v22  ;;  %2923 = vlog2.f32 %v845_v49 }
 0x10c   : > { %v3599_v3 = vpop.eup %2901  ;;  %v775_v11 = vmul.f32 0.6931472, %v2900_v32  ;;  %vm1096_vm8 = vcmp.gt.f32.partialorder %v3314_v13, 20.0  ;;  %vm3605_vm9 = vcmp.lt.f32.partialorder %v815_v46, 0.0004427343  ;;  %v831_v4 = vadd.f32 1.0, %v830_v48 }
 0x10d   : > { %4862 = vst [vmem:[#allocation52_spill] sm:$0xff] %v3599_v3  ;;  %v3602_v59 = vpop.eup %2903  ;;  %v833_v31 = vand.u32 2147483647, %v3525_v18  ;;  %2925 = vlog2.f32 %v854_v45  ;;  %vm1097_vm10 = vcmp.gt.f32.partialorder %v3307_v8, 20.0  ;;  %vm3615_vm11 = vcmp.lt.f32.partialorder %v824_v56, 0.0004427343 }
 0x10e   : > { %v3610_v23 = vpop.eup %2905  ;;  %v781_v1 = vsel %vm3565_vm3, %v778_v38, %v775_v11  ;;  %v840_v22 = vadd.f32 1.0, %v839_v36  ;;  %v842_v46 = vand.u32 2147483647, %v3510_v55  ;;  %v863_v49 = vadd.f32 1.0, %v3571_v16 }
 0x10f   : > { %4865 = vst [vmem:[#allocation53_spill] sm:$0xff] %v3610_v23  ;;  %v3621_v48 = vpop.eup %2907  ;;  %vm1098_vm12 = vcmp.gt.f32.partialorder %v3343_v33, 20.0  ;;  %v1062_v32 = vmul.f32 0.01, %v781_v1  ;;  %v814_v45 = vmul.f32 %v3487_v37, %v813_v12  ;;  %v849_v3 = vadd.f32 1.0, %v848_v57 }
 0x110   : > { %v851_v51 = vand.u32 2147483647, %v3542_v26  ;;  %v2910_v11 = vpop.eup %2909  ;;  %v823_v38 = vmul.f32 %v3473_v25, %v822_v10  ;;  %v857_v56 = vmul.f32 -0.5, %v3534_v19  ;;  %2927 = vlog2.f32 %v863_v49 }
 0x111   : > { %v872_v36 = vadd.f32 1.0, %v3557_v17  ;;  %v2912_v23 = vpop.eup %2911  ;;  %v1126_v24 = vsel %vm1094_vm5, %v3279_v53, %v1062_v32  ;;  %v793_v30 = vmul.f32 0.6931472, %v2910_v11  ;;  %v832_v1 = vmul.f32 %v3525_v18, %v831_v4 }
 0x112   : > { %vm3633_vm13 = vcmp.lt.f32.partialorder %v833_v31, 0.0004427343  ;;  %v2914_v37 = vpop.eup %2913  ;;  %vm1099_vm14 = vcmp.gt.f32.partialorder %v3336_v27, 20.0  ;;  %vm1100_vm15 = vcmp.gt.f32.partialorder %v3374_v0, 20.0  ;;  %2723 = vmatprep.mubr.msk.f32.mxu1 %vm1173_vm4, %v1126_v24  ;;  %v802_v25 = vmul.f32 0.6931472, %v2912_v23 }
 0x113   : > { %v841_v12 = vmul.f32 %v3510_v55, %v840_v22  ;;  %vm3641_vm0 = vcmp.lt.f32.partialorder %v842_v46, 0.0004427343  ;;  %2929 = vlog2.f32 %v872_v36  ;;  %v3645_v53 = vpop.eup %2915  ;;  %2724 = vmatmul.mubr.msk.f32.vlgmr.msra.gmra.mxu1 %vm1173_vm4, %v3549_v29  ;;  %v799_v31 = vsel %vm3586_vm6, %v3580_v42, %v793_v30 }
 0x114   : > { %v811_v18 = vmul.f32 0.6931472, %v2914_v37  ;;  %v850_v24 = vmul.f32 %v3542_v26, %v849_v3  ;;  %vm3653_vm1 = vcmp.lt.f32.partialorder %v851_v51, 0.0004427343  ;;  %v860_v55 = vand.u32 2147483647, %v3534_v19  ;;  %v2918_v10 = vpop.eup %2917 }
 0x115   : > { %v1064_v4 = vmul.f32 0.01, %v799_v31  ;;  %v808_v22 = vsel %vm3593_vm7, %v805_v44, %v802_v25  ;;  %v858_v46 = vadd.f32 1.0, %v857_v56  ;;  %v881_v29 = vadd.f32 1.0, %v3602_v59  ;;  %v2920_v49 = vpop.eup %2919 }
 0x116   : > { %v1065_v5 = vmul.f32 0.01, %v808_v22  ;;  %v817_v30 = vsel %vm3605_vm9, %v814_v45, %v811_v18  ;;  %v820_v3 = vmul.f32 0.6931472, %v2918_v10  ;;  %v866_v42 = vmul.f32 -0.5, %v3571_v16 }
 0x117   : > { %vm1101_vm2 = vcmp.gt.f32.partialorder %v3363_v50, 20.0  ;;  %vm1102_vm3 = vcmp.gt.f32.partialorder %v3401_v28, 20.0  ;;  %v1128_v26 = vsel %vm1096_vm8, %v3297_v2, %v1064_v4  ;;  %v1066_v44 = vmul.f32 0.01, %v817_v30  ;;  %v2922_v32 = vpop.eup %2921 }
 0x118   : > { %v829_v40 = vmul.f32 0.6931472, %v2920_v49  ;;  %2931 = vlog2.f32 %v881_v29  ;;  %2726 = vmatprep.mubr.msk.f32.mxu1 %vm1173_vm4, %v1128_v26  ;;  %v1129_v54 = vsel %vm1097_vm10, %v3288_v61, %v1065_v5  ;;  %v826_v45 = vsel %vm3615_vm11, %v823_v38, %v820_v3  ;;  %v2924_v8 = vpop.eup %2923 }
 0x119   : > { %v869_v51 = vand.u32 2147483647, %v3571_v16  ;;  %v875_v11 = vmul.f32 -0.5, %v3557_v17  ;;  %2727 = vmatmul.mubr.msk.f32.gmra.mxu1 %vm1173_vm4, %v1129_v54  ;;  %v1130_v2 = vsel %vm1098_vm12, %v3328_v21, %v1066_v44  ;;  %v1067_v13 = vmul.f32 0.01, %v826_v45 }
 0x11a   : > { %v835_v56 = vsel %vm3633_vm13, %v832_v1, %v829_v40  ;;  %v838_v36 = vmul.f32 0.6931472, %v2922_v32  ;;  %2729 = vmatprep.mubr.msk.f32.mxu1 %vm1173_vm4, %v1130_v2  ;;  %vm3684_vm5 = vcmp.lt.f32.partialorder %v860_v55, 0.0004427343  ;;  %v884_v38 = vmul.f32 -0.5, %v3602_v59  ;;  %v2926_v25 = vpop.eup %2925 }
 0x11b   : > { %v1068_v61 = vmul.f32 0.01, %v835_v56  ;;  %v890_v37 = vadd.f32 1.0, %v3584_v52  ;;  %vm1103_vm6 = vcmp.gt.f32.partialorder %v3390_v20, 20.0  ;;  %vm1104_vm7 = vcmp.gt.f32.partialorder %v3441_v41, 20.0  ;;  %v4876_v56 = vld [vmem:[#allocation21_spill] sm:$0xff] }
 0x11c   : > { %v844_v21 = vsel %vm3641_vm0, %v841_v12, %v838_v36  ;;  %v847_v33 = vmul.f32 0.6931472, %v2924_v8  ;;  %v859_v1 = vmul.f32 %v3534_v19, %v858_v46  ;;  %v867_v57 = vadd.f32 1.0, %v866_v42  ;;  %v4877_v8 = vld [vmem:[#allocation30_spill] sm:$0xff] }
 0x11d   : > { %v1131_v31 = vsel %vm1099_vm14, %v3317_v14, %v1067_v13  ;;  %v1132_v18 = vsel %vm1100_vm15, %v3358_v43, %v1068_v61  ;;  %v1069_v55 = vmul.f32 0.01, %v844_v21  ;;  %v856_v10 = vmul.f32 0.6931472, %v2926_v25  ;;  %v2928_v19 = vpop.eup %2927 }
 0x11e   : > { %2730 = vmatmul.mubr.msk.f32.gmra.mxu1 %vm1173_vm4, %v1131_v31  ;;  %v853_v62 = vsel %vm3653_vm1, %v850_v24, %v847_v33  ;;  %v876_v12 = vadd.f32 1.0, %v875_v11  ;;  %v878_v4 = vand.u32 2147483647, %v3557_v17  ;;  %2933 = vlog2.f32 %v890_v37  ;;  %v4880_v33 = vld [vmem:[#allocation41_spill] sm:$0xff] }
 0x11f   : > { %2732 = vmatprep.mubr.msk.f32.mxu1 %vm1173_vm4, %v1132_v18  ;;  %v1070_v27 = vmul.f32 0.01, %v853_v62  ;;  %v862_v14 = vsel %vm3684_vm5, %v859_v1, %v856_v10  ;;  %v885_v0 = vadd.f32 1.0, %v884_v38  ;;  %v899_v43 = vadd.f32 1.0, %v3645_v53  ;;  %v4902_v38 = vld [vmem:[#allocation44_spill] sm:$0xff] }
 0x120   : > { %vm1105_vm8 = vcmp.gt.f32.partialorder %v3424_v9, 20.0  ;;  %v865_v22 = vmul.f32 0.6931472, %v2928_v19  ;;  %v868_v23 = vmul.f32 %v3571_v16, %v867_v57  ;;  %vm870_vm9 = vcmp.lt.f32.partialorder %v869_v51, 0.0004427343  ;;  %v2930_v46 = vpop.eup %2929  ;;  %v4881_v9 = vld [vmem:[#allocation32_spill] sm:$0xff] }
 0x121   : > { %v893_v24 = vmul.f32 -0.5, %v3584_v52  ;;  %v1133_v29 = vsel %vm1101_vm2, %v3346_v34, %v1069_v55  ;;  %v1134_v49 = vsel %vm1102_vm3, %v3387_v15, %v1070_v27  ;;  %v1071_v5 = vmul.f32 0.01, %v862_v14  ;;  %v4888_v14 = vld [vmem:[#allocation40_spill] sm:$0xff] }
 0x122   : > { %2935 = vlog2.f32 %v899_v43  ;;  %vm1106_vm10 = vcmp.gt.f32.partialorder %v3479_v35, 20.0  ;;  %2733 = vmatmul.mubr.msk.f32.gmra.mxu1 %vm1173_vm4, %v1133_v29  ;;  %v871_v30 = vsel %vm870_vm9, %v868_v23, %v865_v22  ;;  %v874_v16 = vmul.f32 0.6931472, %v2930_v46  ;;  %v4889_v29 = vld [vmem:[#allocation6_spill] sm:$0xff] }
 0x123   : > { %v877_v3 = vmul.f32 %v3557_v17, %v876_v12  ;;  %v908_v42 = vadd.f32 1.0, %v3621_v48  ;;  %2735 = vmatprep.mubr.msk.f32.mxu1 %vm1173_vm4, %v1134_v49  ;;  %v1072_v50 = vmul.f32 0.01, %v871_v30  ;;  %vm879_vm11 = vcmp.lt.f32.partialorder %v878_v4, 0.0004427343  ;;  %v4887_v4 = vld [vmem:[#allocation38_spill] sm:$0xff] }
 0x124   : > { %v886_v34 = vmul.f32 %v3602_v59, %v885_v0  ;;  %v887_v15 = vand.u32 2147483647, %v3602_v59  ;;  %v902_v26 = vmul.f32 -0.5, %v3645_v53  ;;  %v917_v44 = vadd.f32 1.0, %v3432_v7 }
 0x125   : > { %v880_v28 = vsel %vm879_vm11, %v877_v3, %v874_v16  ;;  %2937 = vlog2.f32 %v908_v42  ;;  %v2932_v40 = vpop.eup %2931  ;;  %v1135_v17 = vsel %vm1103_vm6, %v3377_v6, %v1071_v5  ;;  %v1136_v32 = vsel %vm1104_vm7, %v3420_v58, %v1072_v50  ;;  %v4892_v16 = vld [vmem:[#allocation34_spill] sm:$0xff]  ;;  %v4893_v42 = vld [vmem:[#allocation25_spill] sm:$0xff] }
 0x126   : > { %v1073_v54 = vmul.f32 0.01, %v880_v28  ;;  %v894_v45 = vadd.f32 1.0, %v893_v24  ;;  %2736 = vmatmul.mubr.msk.f32.gmra.mxu1 %vm1173_vm4, %v1135_v17  ;;  %v883_v59 = vmul.f32 0.6931472, %v2932_v40  ;;  %v911_v11 = vmul.f32 -0.5, %v3621_v48 }
 0x127   : > { %v896_v51 = vand.u32 2147483647, %v3584_v52  ;;  %2939 = vlog2.f32 %v917_v44  ;;  %2738 = vmatprep.mubr.msk.f32.mxu1 %vm1173_vm4, %v1136_v32  ;;  %vm888_vm12 = vcmp.lt.f32.partialorder %v887_v15, 0.0004427343  ;;  %v905_v6 = vand.u32 2147483647, %v3645_v53 }
 0x128   : > { %2941 = vpow2.f32 %v3559_v60  ;;  %v926_v41 = vadd.f32 1.0, %v3410_v39  ;;  %vm1107_vm13 = vcmp.gt.f32.partialorder %v3456_v47, 20.0  ;;  %v889_v20 = vsel %vm888_vm12, %v886_v34, %v883_v59  ;;  %v4896_v32 = vld [vmem:[#allocation4_spill] sm:$0xff] }
 0x129   : > { %v903_v58 = vadd.f32 1.0, %v902_v26  ;;  %v914_v2 = vand.u32 2147483647, %v3621_v48  ;;  %v920_v13 = vmul.f32 -0.5, %v3432_v7  ;;  %v1137_v36 = vsel %vm1105_vm8, %v4876_v56, %v1073_v54 }
 0x12a   : > { %v1074_v60 = vmul.f32 0.01, %v889_v20  ;;  %2943 = vlog2.f32 %v926_v41  ;;  %v935_v61 = vadd.f32 1.0, %v4877_v8  ;;  %2739 = vmatmul.mubr.msk.f32.gmra.mxu1 %vm1173_vm4, %v1137_v36  ;;  %v895_v63 = vmul.f32 %v3584_v52, %v894_v45  ;;  %v4884_v52 = vld [vmem:[#allocation28_spill] sm:$0xff]  ;;  %v4899_v45 = vld [vmem:[#allocation46_spill] sm:$0xff] }
 0x12b   : > { %vm3749_vm14 = vcmp.lt.f32.partialorder %v896_v51, 0.0004427343  ;;  %v912_v37 = vadd.f32 1.0, %v911_v11  ;;  %v929_v25 = vmul.f32 -0.5, %v3410_v39  ;;  %v2934_v21 = vpop.eup %2933  ;;  %vm1108_vm15 = vcmp.gt.f32.partialorder %v4880_v33, 20.0  ;;  %v4900_v11 = vld [vmem:[#allocation37_spill] sm:$0xff] }
 0x12c   : > { %v1138_v1 = vsel %vm1106_vm10, %v4881_v9, %v1074_v60  ;;  %vm3758_vm0 = vcmp.lt.f32.partialorder %v905_v6, 0.0004427343  ;;  %2945 = vlog2.f32 %v935_v61  ;;  %v944_v31 = vadd.f32 1.0, %v4884_v52 }
 0x12d   : > { %2741 = vmatprep.mubr.msk.f32.mxu1 %vm1173_vm4, %v1138_v1  ;;  %v892_v18 = vmul.f32 0.6931472, %v2934_v21  ;;  %v904_v55 = vmul.f32 %v3645_v53, %v903_v58  ;;  %v921_v10 = vadd.f32 1.0, %v920_v13  ;;  %v923_v62 = vand.u32 2147483647, %v3432_v7  ;;  %v4901_v58 = vld [vmem:[#allocation9_spill] sm:$0xff] }
 0x12e   : > { %vm3766_vm1 = vcmp.lt.f32.partialorder %v914_v2, 0.0004427343  ;;  %v938_v35 = vmul.f32 -0.5, %v4877_v8  ;;  %2947 = vlog2.f32 %v944_v31  ;;  %v953_v19 = vadd.f32 1.0, %v4887_v4  ;;  %v4904_v21 = vld [vmem:[#allocation36_spill] sm:$0xff] }
 0x12f   : > { %v2936_v27 = vpop.eup %2935  ;;  %vm1109_vm2 = vcmp.gt.f32.partialorder %v4888_v14, 20.0  ;;  %v898_v0 = vsel %vm3749_vm14, %v895_v63, %v892_v18  ;;  %v913_v53 = vmul.f32 %v3621_v48, %v912_v37  ;;  %v930_v43 = vadd.f32 1.0, %v929_v25  ;;  %v4903_v25 = vld [vmem:[#allocation8_spill] sm:$0xff] }
 0x130   : > { %v932_v22 = vand.u32 2147483647, %v3410_v39  ;;  %v1075_v23 = vmul.f32 0.01, %v898_v0  ;;  %v901_v24 = vmul.f32 0.6931472, %v2936_v27  ;;  %2949 = vlog2.f32 %v953_v19 }
 0x131   : > { %v941_v46 = vand.u32 2147483647, %v4877_v8  ;;  %vm1110_vm3 = vcmp.gt.f32.partialorder %v4889_v29, 20.0  ;;  %v922_v49 = vmul.f32 %v3432_v7, %v921_v10  ;;  %vm3780_vm5 = vcmp.lt.f32.partialorder %v923_v62, 0.0004427343  ;;  %v4907_v10 = vld [vmem:[#allocation13_spill] sm:$0xff] }
 0x132   : > { %v947_v30 = vmul.f32 -0.5, %v4884_v52  ;;  %v962_v48 = vadd.f32 1.0, %v4892_v16  ;;  %v2938_v3 = vpop.eup %2937  ;;  %v1139_v50 = vsel %vm1107_vm13, %v4893_v42, %v1075_v23  ;;  %v907_v34 = vsel %vm3758_vm0, %v904_v55, %v901_v24  ;;  %v4908_v62 = vld [vmem:[#allocation3_spill] sm:$0xff]  ;;  %v4909_v27 = vld [vmem:[#allocation49_spill] sm:$0xff]  ;;  %v4914_v42 = vld [vmem:[#allocation12_spill] sm:$0xff] }
 0x133   : > { %v939_v15 = vadd.f32 1.0, %v938_v35  ;;  %v956_v28 = vmul.f32 -0.5, %v4887_v4  ;;  %2742 = vmatmul.mubr.msk.f32.gmra.mxu1 %vm1173_vm4, %v1139_v50  ;;  %v1076_v7 = vmul.f32 0.01, %v907_v34  ;;  %v910_v26 = vmul.f32 0.6931472, %v2938_v3 }
 0x134   : > { %v931_v44 = vmul.f32 %v3410_v39, %v930_v43  ;;  %vm3794_vm6 = vcmp.lt.f32.partialorder %v932_v22, 0.0004427343  ;;  %v2940_v17 = vpop.eup %2939  ;;  %vm1111_vm7 = vcmp.gt.f32.partialorder %v4896_v32, 20.0  ;;  %vm3799_vm8 = vcmp.lt.f32.partialorder %v941_v46, 0.0004427343  ;;  %v4915_v50 = vld [vmem:[#allocation48_spill] sm:$0xff] }
 0x135   : > { %v950_v54 = vand.u32 2147483647, %v4884_v52  ;;  %2951 = vlog2.f32 %v962_v48  ;;  %v971_v59 = vadd.f32 1.0, %v4899_v45  ;;  %v3805_v51 = vpop.eup %2941  ;;  %v1140_v39 = vsel %vm1108_vm15, %v4900_v11, %v1076_v7  ;;  %v4918_v7 = vld [vmem:[#allocation7_spill] sm:$0xff]  ;;  %v4932_v43 = vld [vmem:[#allocation52_spill] sm:$0xff] }
 0x136   : > { %v916_v6 = vsel %vm3766_vm1, %v913_v53, %v910_v26  ;;  %v919_v41 = vmul.f32 0.6931472, %v2940_v17  ;;  %v948_v20 = vadd.f32 1.0, %v947_v30  ;;  %vm1112_vm9 = vcmp.gt.f32.partialorder %v4901_v58, 20.0  ;;  %2744 = vmatprep.mubr.msk.f32.mxu1 %vm1173_vm4, %v1140_v39  ;;  %v4920_v39 = vld [vmem:[#allocation5_spill] sm:$0xff] }
 0x137   : > { %v1077_v2 = vmul.f32 0.01, %v916_v6  ;;  %v940_v13 = vmul.f32 %v4877_v8, %v939_v15  ;;  %v957_v56 = vadd.f32 1.0, %v956_v28  ;;  %2953 = vlog2.f32 %v971_v59  ;;  %v2944_v36 = vpop.eup %2943 }
 0x138   : > { %v925_v60 = vsel %vm3780_vm5, %v922_v49, %v919_v41  ;;  %v959_v61 = vand.u32 2147483647, %v4887_v4  ;;  %v965_v63 = vmul.f32 -0.5, %v4892_v16  ;;  %v980_v37 = vadd.f32 1.0, %v4902_v38  ;;  %v4912_v49 = vld [vmem:[#allocation2_spill] sm:$0xff] }
 0x139   : > { %vm1113_vm10 = vcmp.gt.f32.partialorder %v4903_v25, 20.0  ;;  %v1141_v33 = vsel %vm1109_vm2, %v4904_v21, %v1077_v2  ;;  %v1078_v9 = vmul.f32 0.01, %v925_v60  ;;  %v928_v8 = vmul.f32 0.6931472, %v2944_v36  ;;  %v2946_v57 = vpop.eup %2945  ;;  %v4921_v36 = vld [vmem:[#allocation18_spill] sm:$0xff] }
 0x13a   : > { %v974_v1 = vmul.f32 -0.5, %v4899_v45  ;;  %2745 = vmatmul.mubr.msk.f32.gmra.mxu1 %vm1173_vm4, %v1141_v33  ;;  %v949_v31 = vmul.f32 %v4884_v52, %v948_v20  ;;  %vm3827_vm11 = vcmp.lt.f32.partialorder %v950_v54, 0.0004427343  ;;  %v968_v55 = vand.u32 2147483647, %v4892_v16  ;;  %v4919_v54 = vld [vmem:[#allocation51_spill] sm:$0xff] }
 0x13b   : > { %2955 = vlog2.f32 %v980_v37  ;;  %vm1114_vm12 = vcmp.gt.f32.partialorder %v4907_v10, 20.0  ;;  %v1142_v12 = vsel %vm1110_vm3, %v4908_v62, %v1078_v9  ;;  %v934_v35 = vsel %vm3794_vm6, %v931_v44, %v928_v8  ;;  %v2948_v52 = vpop.eup %2947  ;;  %v4922_v60 = vld [vmem:[#allocation11_spill] sm:$0xff] }
 0x13c   : > { %v937_v19 = vmul.f32 0.6931472, %v2946_v57  ;;  %v989_v14 = vadd.f32 1.0, %v4909_v27  ;;  %2747 = vmatprep.mubr.msk.f32.mxu1 %vm1173_vm4, %v1142_v12  ;;  %v1079_v0 = vmul.f32 0.01, %v934_v35  ;;  %v958_v53 = vmul.f32 %v4887_v4, %v957_v56  ;;  %v4913_v4 = vld [vmem:[#allocation47_spill] sm:$0xff] }
 0x13d   : > { %vm3841_vm13 = vcmp.lt.f32.partialorder %v959_v61, 0.0004427343  ;;  %v966_v22 = vadd.f32 1.0, %v965_v63  ;;  %v946_v24 = vmul.f32 0.6931472, %v2948_v52  ;;  %v975_v46 = vadd.f32 1.0, %v974_v1  ;;  %v2950_v29 = vpop.eup %2949 }
 0x13e   : > { %v943_v23 = vsel %vm3799_vm8, %v940_v13, %v937_v19  ;;  %2957 = vlog2.f32 %v989_v14  ;;  %v1143_v5 = vsel %vm1111_vm7, %v4912_v49, %v1079_v0  ;;  %v983_v48 = vmul.f32 -0.5, %v4902_v38  ;;  %v4926_v57 = vld [vmem:[#allocation53_spill] sm:$0xff]  ;;  %v4929_v35 = vld [vmem:[#allocation10_spill] sm:$0xff] }
 0x13f   : > { %v1080_v30 = vmul.f32 0.01, %v943_v23  ;;  %v998_v3 = vadd.f32 1.0, %v4913_v4  ;;  %vm1115_vm14 = vcmp.gt.f32.partialorder %v4914_v42, 20.0  ;;  %2959 = vpow2.f32 %v4915_v50  ;;  %2748 = vmatmul.mubr.msk.f32.gmra.mxu1 %vm1173_vm4, %v1143_v5  ;;  %v4934_v5 = vld [vmem:[#allocation16_spill] sm:$0xff]  ;;  %v4948_v0 = vld [vmem:[#allocation26_spill] sm:$0xff] }
 0x140   : > { %v952_v34 = vsel %vm3827_vm11, %v949_v31, %v946_v24  ;;  %v955_v15 = vmul.f32 0.6931472, %v2950_v29  ;;  %vm3857_vm15 = vcmp.lt.f32.partialorder %v968_v55, 0.0004427343  ;;  %v977_v40 = vand.u32 2147483647, %v4899_v45 }
 0x141   : > { %v1144_v26 = vsel %vm1112_vm9, %v4918_v7, %v1080_v30  ;;  %v1081_v44 = vmul.f32 0.01, %v952_v34  ;;  %2961 = vlog2.f32 %v998_v3  ;;  %v967_v32 = vmul.f32 %v4892_v16, %v966_v22  ;;  %v4933_v24 = vld [vmem:[#allocation15_spill] sm:$0xff] }
 0x142   : > { %2750 = vmatprep.mubr.msk.f32.mxu1 %vm1173_vm4, %v1144_v26  ;;  %v961_v17 = vsel %vm3841_vm13, %v958_v53, %v955_v15  ;;  %v992_v47 = vmul.f32 -0.5, %v4909_v27  ;;  %v1007_v59 = vadd.f32 1.0, %v4919_v54  ;;  %v2952_v11 = vpop.eup %2951  ;;  %v976_v20 = vmul.f32 %v4899_v45, %v975_v46  ;;  %v4925_v45 = vld [vmem:[#allocation50_spill] sm:$0xff]  ;;  %v4935_v7 = vld [vmem:[#allocation23_spill] sm:$0xff] }
 0x143   : > { %v1145_v6 = vsel %vm1113_vm10, %v4920_v39, %v1081_v44  ;;  %v1082_v41 = vmul.f32 0.01, %v961_v17  ;;  %v984_v58 = vadd.f32 1.0, %v983_v48  ;;  %v964_v2 = vmul.f32 0.6931472, %v2952_v11  ;;  %v4936_v26 = vld [vmem:[#allocation14_spill] sm:$0xff] }
 0x144   : > { %2751 = vmatmul.mubr.msk.f32.gmra.mxu1 %vm1173_vm4, %v1145_v6  ;;  %v986_v13 = vand.u32 2147483647, %v4902_v38  ;;  %v1001_v16 = vmul.f32 -0.5, %v4913_v4  ;;  %2963 = vlog2.f32 %v1007_v59  ;;  %v2954_v56 = vpop.eup %2953  ;;  %vm1116_vm0 = vcmp.gt.f32.partialorder %v4921_v36, 20.0  ;;  %v4953_v17 = vld [vmem:[#allocation27_spill] sm:$0xff] }
 0x145   : > { %v1146_v61 = vsel %vm1114_vm12, %v4922_v60, %v1082_v41  ;;  %vm3882_vm1 = vcmp.lt.f32.partialorder %v977_v40, 0.0004427343  ;;  %v1016_v37 = vadd.f32 1.0, %v4925_v45  ;;  %v970_v25 = vsel %vm3857_vm15, %v967_v32, %v964_v2  ;;  %v4942_v60 = vld [vmem:[#allocation20_spill] sm:$0xff] }
 0x146   : > { %2753 = vmatprep.mubr.msk.f32.mxu1 %vm1173_vm4, %v1146_v61  ;;  %v973_v21 = vmul.f32 0.6931472, %v2954_v56  ;;  %v993_v33 = vadd.f32 1.0, %v992_v47  ;;  %v995_v9 = vand.u32 2147483647, %v4909_v27  ;;  %v985_v1 = vmul.f32 %v4902_v38, %v984_v58 }
 0x147   : > { %v1083_v8 = vmul.f32 0.01, %v970_v25  ;;  %2965 = vlog2.f32 %v1016_v37  ;;  %v1025_v31 = vadd.f32 1.0, %v4926_v57  ;;  %vm3895_vm2 = vcmp.lt.f32.partialorder %v986_v13, 0.0004427343  ;;  %v4943_v25 = vld [vmem:[#allocation17_spill] sm:$0xff] }
 0x148   : > { %v2956_v18 = vpop.eup %2955  ;;  %v979_v55 = vsel %vm3882_vm1, %v976_v20, %v973_v21  ;;  %v1002_v62 = vadd.f32 1.0, %v1001_v16  ;;  %v1010_v12 = vmul.f32 -0.5, %v4919_v54  ;;  %v994_v52 = vmul.f32 %v4909_v27, %v993_v33  ;;  %v4941_v20 = vld [vmem:[#allocation19_spill] sm:$0xff] }
 0x149   : > { %v1147_v19 = vsel %vm1115_vm14, %v4929_v35, %v1083_v8  ;;  %v1084_v14 = vmul.f32 0.01, %v979_v55  ;;  %v982_v38 = vmul.f32 0.6931472, %v2956_v18  ;;  %2967 = vlog2.f32 %v1025_v31  ;;  %v4946_v55 = vld [vmem:[#allocation29_spill] sm:$0xff] }
 0x14a   : > { %2754 = vmatmul.mubr.msk.f32.gmra.mxu1 %vm1173_vm4, %v1147_v19  ;;  %vm3905_vm3 = vcmp.lt.f32.partialorder %v995_v9, 0.0004427343  ;;  %v1004_v53 = vand.u32 2147483647, %v4913_v4  ;;  %v1034_v22 = vadd.f32 1.0, %v4932_v43  ;;  %v1019_v27 = vmul.f32 -0.5, %v4925_v45 }
 0x14b   : > { %v2958_v23 = vpop.eup %2957  ;;  %v1148_v46 = vsel %vm1116_vm0, %v4933_v24, %v1084_v14  ;;  %v988_v29 = vsel %vm3895_vm2, %v985_v1, %v982_v38  ;;  %v1013_v49 = vand.u32 2147483647, %v4919_v54  ;;  %vm1117_vm5 = vcmp.gt.f32.partialorder %v4934_v5, 20.0  ;;  %v4949_v24 = vld [vmem:[#allocation22_spill] sm:$0xff] }
 0x14c   : > { %2756 = vmatprep.mubr.msk.f32.mxu1 %vm1173_vm4, %v1148_v46  ;;  %v1085_v30 = vmul.f32 0.01, %v988_v29  ;;  %v991_v48 = vmul.f32 0.6931472, %v2958_v23  ;;  %v1011_v3 = vadd.f32 1.0, %v1010_v12  ;;  %v3920_v42 = vpop.eup %2959  ;;  %v1003_v50 = vmul.f32 %v4913_v4, %v1002_v62  ;;  %v4947_v12 = vld [vmem:[#allocation24_spill] sm:$0xff] }
 0x14d   : > { %v1028_v34 = vmul.f32 -0.5, %v4926_v57  ;;  %2969 = vlog2.f32 %v1034_v22  ;;  %v1043_v15 = vadd.f32 1.0, %v3805_v51  ;;  %vm1118_vm6 = vcmp.gt.f32.partialorder %v4935_v7, 20.0 }
 0x14e   : > { %v2962_v28 = vpop.eup %2961  ;;  %v1149_v44 = vsel %vm1117_vm5, %v4936_v26, %v1085_v30  ;;  %v997_v40 = vsel %vm3905_vm3, %v994_v52, %v991_v48  ;;  %vm3929_vm7 = vcmp.lt.f32.partialorder %v1004_v53, 0.0004427343  ;;  %v1020_v47 = vadd.f32 1.0, %v1019_v27  ;;  %v4950_v27 = vld [vmem:[#allocation35_spill] sm:$0xff] }
 0x14f   : > { %2757 = vmatmul.mubr.msk.f32.gmra.mxu1 %vm1173_vm4, %v1149_v44  ;;  %v1086_v4 = vmul.f32 0.01, %v997_v40  ;;  %v1000_v32 = vmul.f32 0.6931472, %v2962_v28  ;;  %2971 = vlog2.f32 %v1043_v15  ;;  %v1012_v59 = vmul.f32 %v4919_v54, %v1011_v3  ;;  %v4952_v44 = vld [vmem:[#allocation31_spill] sm:$0xff] }
 0x150   : > { %vm3935_vm8 = vcmp.lt.f32.partialorder %v1013_v49, 0.0004427343  ;;  %v1022_v39 = vand.u32 2147483647, %v4925_v45  ;;  %v1052_v6 = vadd.f32 1.0, %v3920_v42  ;;  %v1029_v13 = vadd.f32 1.0, %v1028_v34 }
 0x151   : > { %v2964_v41 = vpop.eup %2963  ;;  %v1150_v58 = vsel %vm1118_vm6, %v4941_v20, %v1086_v4  ;;  %v1006_v2 = vsel %vm3929_vm7, %v1003_v50, %v1000_v32  ;;  %v1037_v16 = vmul.f32 -0.5, %v4932_v43  ;;  %v1031_v36 = vand.u32 2147483647, %v4926_v57  ;;  %v4951_v50 = vld [vmem:[#allocation33_spill] sm:$0xff] }
 0x152   : > { %2759 = vmatprep.mubr.msk.f32.mxu1 %vm1173_vm4, %v1150_v58  ;;  %v1087_v54 = vmul.f32 0.01, %v1006_v2  ;;  %v1009_v56 = vmul.f32 0.6931472, %v2964_v41  ;;  %2973 = vlog2.f32 %v1052_v6  ;;  %vm1119_vm9 = vcmp.gt.f32.partialorder %v4942_v60, 20.0  ;;  %v4957_v41 = vld [vmem:[#allocation39_spill] sm:$0xff] }
 0x153   : > { %v1021_v61 = vmul.f32 %v4925_v45, %v1020_v47  ;;  %v1046_v63 = vmul.f32 -0.5, %v3805_v51  ;;  %vm3953_vm10 = vcmp.lt.f32.partialorder %v1022_v39, 0.0004427343  ;;  %v1030_v31 = vmul.f32 %v4926_v57, %v1029_v13  ;;  %v4954_v47 = vld [vmem:[#allocation45_spill] sm:$0xff]  ;;  %v2013_v2 = vld [vmem:[%s4723_s5 + $0x30] sm:$0xff]  ;;  %v2012_v13 = vld [vmem:[%s4723_s5 + $0x28] sm:$0xff] }
 0x154   : > { %v2966_v37 = vpop.eup %2965  ;;  %v1151_v21 = vsel %vm1119_vm9, %v4943_v25, %v1087_v54  ;;  %v1015_v33 = vsel %vm3935_vm8, %v1012_v59, %v1009_v56  ;;  %v1038_v18 = vadd.f32 1.0, %v1037_v16  ;;  %vm1120_vm11 = vcmp.gt.f32.partialorder %v4946_v55, 20.0  ;;  %v4955_v59 = vld [vmem:[#allocation42_spill] sm:$0xff]  ;;  %v2014_v58 = vld [vmem:[%s4723_s5 + $0x38] sm:$0xff]  ;;  %v2009_v56 = vld [vmem:[%s4723_s5 + $0x10] sm:$0xff] }
 0x155   : > { %2760 = vmatmul.mubr.msk.f32.gmra.mxu1 %vm1173_vm4, %v1151_v21  ;;  %v1088_v8 = vmul.f32 0.01, %v1015_v33  ;;  %v1018_v1 = vmul.f32 0.6931472, %v2966_v37  ;;  %vm1032_vm12 = vcmp.lt.f32.partialorder %v1031_v36, 0.0004427343  ;;  %2771 = vmatprep.subr.mxu0 %v2014_v58 }
 0x156   : > { %v2968_v45 = vpop.eup %2967  ;;  %v1040_v10 = vand.u32 2147483647, %v4932_v43  ;;  %v1055_v62 = vmul.f32 -0.5, %v3920_v42  ;;  %v1047_v38 = vadd.f32 1.0, %v1046_v63  ;;  %v1049_v57 = vand.u32 2147483647, %v3805_v51  ;;  %2772 = vmatpush3.msra.mxu0 %v2014_v58 }
 0x157   : > { %v1152_v35 = vsel %vm1120_vm11, %v4947_v12, %v1088_v8  ;;  %v1024_v19 = vsel %vm3953_vm10, %v1021_v61, %v1018_v1  ;;  %v1027_v14 = vmul.f32 0.6931472, %v2968_v45  ;;  %vm1121_vm13 = vcmp.gt.f32.partialorder %v4948_v0, 20.0  ;;  %2773 = vmatprep.subr.mxu0 %v2013_v2  ;;  %v2011_v16 = vld [vmem:[%s4723_s5 + $0x20] sm:$0xff]  ;;  %v2010_v54 = vld [vmem:[%s4723_s5 + $0x18] sm:$0xff]  ;;  %v2008_v36 = vld [vmem:[%s4723_s5 + $0x8] sm:$0xff] }
 0x158   : > { %2762 = vmatprep.mubr.msk.f32.mxu1 %vm1173_vm4, %v1152_v35  ;;  %v1089_v52 = vmul.f32 0.01, %v1024_v19  ;;  %v1039_v22 = vmul.f32 %v4932_v43, %v1038_v18  ;;  %vm1041_vm14 = vcmp.lt.f32.partialorder %v1040_v10, 0.0004427343  ;;  %v1056_v49 = vadd.f32 1.0, %v1055_v62  ;;  %2774 = vmatpush3.msra.mxu0 %v2013_v2  ;;  %v2007_v60 = vld [vmem:[%s4723_s5] sm:$0xff] }
 0x159   : > { %v1033_v53 = vsel %vm1032_vm12, %v1030_v31, %v1027_v14  ;;  %vm1122_vm15 = vcmp.gt.f32.partialorder %v4950_v27, 20.0  ;;  %v1048_v30 = vmul.f32 %v3805_v51, %v1047_v38  ;;  %v1058_v48 = vand.u32 2147483647, %v3920_v42  ;;  %2775 = vmatprep.subr.mxu0 %v2012_v13  ;;  %v4013_v61 = vld [vmem:[%s4722_s4] ss:$0 sm:$0xff] }
 0x15a   : > { %v2970_v23 = vpop.eup %2969  ;;  %v1153_v46 = vsel %vm1121_vm13, %v4949_v24, %v1089_v52  ;;  %v1090_v29 = vmul.f32 0.01, %v1033_v53  ;;  %vm1050_vm0 = vcmp.lt.f32.partialorder %v1049_v57, 0.0004427343  ;;  %v1057_v7 = vmul.f32 %v3920_v42, %v1056_v49  ;;  %v4956_v42 = vld [vmem:[#allocation43_spill] sm:$0xff]  ;;  %2776 = vmatpush3.msra.mxu0 %v2012_v13 }
 0x15b   : > { %2763 = vmatmul.mubr.msk.f32.gmra.mxu1 %vm1173_vm4, %v1153_v46  ;;  %v1036_v5 = vmul.f32 0.6931472, %v2970_v23  ;;  %vm1123_vm1 = vcmp.gt.f32.partialorder %v4952_v44, 20.0  ;;  %vm1059_vm2 = vcmp.lt.f32.partialorder %v1058_v48, 0.0004427343  ;;  %vm1124_vm3 = vcmp.gt.f32.partialorder %v4954_v47, 20.0  ;;  %2777 = vmatprep.subr.mxu0 %v2011_v16 }
 0x15c   : > { %v2972_v3 = vpop.eup %2971  ;;  %v1154_v34 = vsel %vm1122_vm15, %v4951_v50, %v1090_v29  ;;  %vm1125_vm5 = vcmp.gt.f32.partialorder %v4956_v42, 20.0  ;;  %2778 = vmatpush3.msra.mxu0 %v2011_v16 }
 0x15d   : > { %2765 = vmatprep.mubr.msk.f32.mxu1 %vm1173_vm4, %v1154_v34  ;;  %v1042_v43 = vsel %vm1041_vm14, %v1039_v22, %v1036_v5  ;;  %v1045_v15 = vmul.f32 0.6931472, %v2972_v3  ;;  %2779 = vmatprep.subr.mxu0 %v2010_v54 }
 0x15e   : > { %v1091_v28 = vmul.f32 0.01, %v1042_v43  ;;  %2780 = vmatpush3.msra.mxu0 %v2010_v54 }
 0x15f   : > { %v2974_v26 = vpop.eup %2973  ;;  %v1051_v40 = vsel %vm1050_vm0, %v1048_v30, %v1045_v15  ;;  %2781 = vmatprep.subr.mxu0 %v2009_v56 }
 0x160   : > { %v1155_v51 = vsel %vm1123_vm1, %v4953_v17, %v1091_v28  ;;  %v1092_v4 = vmul.f32 0.01, %v1051_v40  ;;  %v1054_v32 = vmul.f32 0.6931472, %v2974_v26  ;;  %2782 = vmatpush3.msra.mxu0 %v2009_v56 }
 0x161   : > { %2766 = vmatmul.mubr.msk.f32.gmra.mxu1 %vm1173_vm4, %v1155_v51  ;;  %2783 = vmatprep.subr.mxu0 %v2008_v36 }
 0x162   : > { %v1156_v11 = vsel %vm1124_vm3, %v4955_v59, %v1092_v4  ;;  %v1060_v39 = vsel %vm1059_vm2, %v1057_v7, %v1054_v32  ;;  %2784 = vmatpush3.msra.mxu0 %v2008_v36 }
 0x163   : > { %2768 = vmatprep.mubr.msk.f32.mxu1 %vm1173_vm4, %v1156_v11  ;;  %v1093_v6 = vmul.f32 0.01, %v1060_v39  ;;  %2785 = vmatprep.subr.mxu0 %v2007_v60 }
 0x164   : > { %2786 = vmatpush3.msra.mxu0 %v2007_v60 }
 0x165   : > { %v1157_v20 = vsel %vm1125_vm5, %v4957_v41, %v1093_v6 }
 0x166   : > { %2769 = vmatmul.mubr.msk.f32.gmra.mxu1 %vm1173_vm4, %v1157_v20 }
 0x1d3   : > { %v2725_v63 = vpop.f32.mrf.mxu1 }
 0x1d4   : > { %v4016_v37 = vadd.f32 %v2725_v63, %v4013_v61 }
 0x1d5   : > { %v1336_v25 = vpop.f32.mrf.mxu1 }
 0x1d6   : > { %v4019_v21 = vmul.f32 100.0, %v4016_v37  ;;  %v4022_v33 = vadd.f32 %v4013_v61, %v1336_v25 }
 0x1d8   : > { %v1528_v9 = vmin.f32 %v4019_v21, 20.0  ;;  %v4026_v8 = vmul.f32 100.0, %v4022_v33  ;;  %vm1944_vm9 = vcmp.gt.f32.partialorder %v4019_v21, 20.0 }
 0x1d9   : > { %v2728_v1 = vpop.f32.mrf.mxu1 }
 0x1da   : > { %v4029_v31 = vadd.f32 %v2728_v1, %v4013_v61  ;;  %v1561_v18 = vmul.f32 1.442695, %v1528_v9  ;;  %v1527_v45 = vmin.f32 %v4026_v8, 20.0  ;;  %vm1943_vm7 = vcmp.gt.f32.partialorder %v4026_v8, 20.0 }
 0x1db   : > { %v1346_v55 = vpop.f32.mrf.mxu1 }
 0x1dc   : > { %v4033_v10 = vmul.f32 100.0, %v4029_v31  ;;  %v4036_v62 = vadd.f32 %v4013_v61, %v1346_v55  ;;  %2975 = vpow2.f32 %v1561_v18  ;;  %v1559_v12 = vmul.f32 1.442695, %v1527_v45 }
 0x1de   : > { %v2731_v35 = vpop.f32.mrf.mxu1  ;;  %v1530_v19 = vmin.f32 %v4033_v10, 20.0  ;;  %v4040_v14 = vmul.f32 100.0, %v4036_v62  ;;  %2977 = vpow2.f32 %v1559_v12  ;;  %vm1946_vm13 = vcmp.gt.f32.partialorder %v4033_v10, 20.0 }
 0x1df   : > { %v4044_v57 = vadd.f32 %v2731_v35, %v4013_v61 }
 0x1e0   : > { %v1356_v38 = vpop.f32.mrf.mxu1  ;;  %v1529_v52 = vmin.f32 %v4040_v14, 20.0  ;;  %v1565_v0 = vmul.f32 1.442695, %v1530_v19  ;;  %vm1945_vm10 = vcmp.gt.f32.partialorder %v4040_v14, 20.0 }
 0x1e1   : > { %v4047_v53 = vadd.f32 %v4013_v61, %v1356_v38  ;;  %v4053_v29 = vmul.f32 100.0, %v4044_v57 }
 0x1e2   : > { %v2734_v22 = vpop.f32.mrf.mxu1  ;;  %v1563_v23 = vmul.f32 1.442695, %v1529_v52 }
 0x1e3   : > { %v4050_v24 = vmul.f32 100.0, %v4047_v53  ;;  %v4057_v27 = vadd.f32 %v2734_v22, %v4013_v61  ;;  %v1532_v50 = vmin.f32 %v4053_v29, 20.0  ;;  %vm1948_vm1 = vcmp.gt.f32.partialorder %v4053_v29, 20.0 }
 0x1e4   : > { %v1366_v46 = vpop.f32.mrf.mxu1  ;;  %2979 = vpow2.f32 %v1563_v23 }
 0x1e5   : > { %2981 = vpow2.f32 %v1565_v0  ;;  %v1531_v49 = vmin.f32 %v4050_v24, 20.0  ;;  %v4060_v30 = vadd.f32 %v4013_v61, %v1366_v46  ;;  %v4064_v34 = vmul.f32 100.0, %v4057_v27 }
 0x1e6   : > { %v2737_v5 = vpop.f32.mrf.mxu1  ;;  %v1569_v40 = vmul.f32 1.442695, %v1532_v50  ;;  %vm1947_vm15 = vcmp.gt.f32.partialorder %v4050_v24, 20.0 }
 0x1e7   : > { %v1567_v48 = vmul.f32 1.442695, %v1531_v49  ;;  %v4067_v28 = vmul.f32 100.0, %v4060_v30  ;;  %v4070_v7 = vadd.f32 %v2737_v5, %v4013_v61  ;;  %v1534_v51 = vmin.f32 %v4064_v34, 20.0 }
 0x1e8   : > { %v1376_v3 = vpop.f32.mrf.mxu1  ;;  %vm1950_vm5 = vcmp.gt.f32.partialorder %v4064_v34, 20.0 }
 0x1e9   : > { %2983 = vpow2.f32 %v1567_v48  ;;  %v2976_v15 = vpop.eup %2975  ;;  %v4075_v17 = vadd.f32 %v4013_v61, %v1376_v3  ;;  %v1533_v32 = vmin.f32 %v4067_v28, 20.0  ;;  %v4080_v47 = vmul.f32 100.0, %v4070_v7 }
 0x1ea   : > { %v2740_v43 = vpop.f32.mrf.mxu1  ;;  %v1632_v26 = vadd.f32 1.0, %v2976_v15  ;;  %v1573_v41 = vmul.f32 1.442695, %v1534_v51  ;;  %v1635_v54 = vmul.f32 -0.5, %v2976_v15  ;;  %v1638_v19 = vand.u32 2147483647, %v2976_v15 }
 0x1eb   : > { %v4072_v44 = vpop.eup %2977  ;;  %v4083_v59 = vadd.f32 %v2740_v43, %v4013_v61  ;;  %v4087_v39 = vmul.f32 100.0, %v4075_v17  ;;  %v1571_v2 = vmul.f32 1.442695, %v1533_v32  ;;  %v1536_v13 = vmin.f32 %v4080_v47, 20.0 }
 0x1ec   : > { %2985 = vlog2.f32 %v1632_v26  ;;  %v1386_v4 = vpop.f32.mrf.mxu1  ;;  %v1623_v11 = vadd.f32 1.0, %v4072_v44  ;;  %v1626_v1 = vmul.f32 -0.5, %v4072_v44  ;;  %v1636_v35 = vadd.f32 1.0, %v1635_v54 }
 0x1ed   : > { %2987 = vpow2.f32 %v1569_v40  ;;  %v4090_v6 = vadd.f32 %v4013_v61, %v1386_v4  ;;  %v4098_v16 = vmul.f32 100.0, %v4083_v59  ;;  %v1535_v63 = vmin.f32 %v4087_v39, 20.0 }
 0x1ee   : > { %2989 = vlog2.f32 %v1623_v11  ;;  %v1577_v55 = vmul.f32 1.442695, %v1536_v13  ;;  %v1629_v23 = vand.u32 2147483647, %v4072_v44  ;;  %v1627_v48 = vadd.f32 1.0, %v1626_v1 }
 0x1ef   : > { %v4106_v25 = vmul.f32 100.0, %v4090_v6  ;;  %2991 = vpow2.f32 %v1573_v41  ;;  %v1538_v12 = vmin.f32 %v4098_v16, 20.0  ;;  %v1575_v0 = vmul.f32 1.442695, %v1535_v63 }
 0x1f0   : > { %2993 = vpow2.f32 %v1571_v2  ;;  %v1637_v40 = vmul.f32 %v2976_v15, %v1636_v35  ;;  %vm4127_vm6 = vcmp.lt.f32.partialorder %v1638_v19, 0.0004427343  ;;  %v1628_v54 = vmul.f32 %v4072_v44, %v1627_v48 }
 0x1f1   : > { %v4092_v42 = vpop.eup %2979  ;;  %v1537_v22 = vmin.f32 %v4106_v25, 20.0  ;;  %v1581_v43 = vmul.f32 1.442695, %v1538_v12  ;;  %vm4140_vm8 = vcmp.lt.f32.partialorder %v1629_v23, 0.0004427343  ;;  %vm1949_vm3 = vcmp.gt.f32.partialorder %v4067_v28, 20.0 }
 0x1f2   : > { %v4094_v58 = vpop.eup %2981  ;;  %v1641_v60 = vadd.f32 1.0, %v4092_v42  ;;  %v1644_v46 = vmul.f32 -0.5, %v4092_v42  ;;  %v1647_v1 = vand.u32 2147483647, %v4092_v42 }
 0x1f3   : > { %v2743_v20 = vpop.f32.mrf.mxu1  ;;  %v1650_v18 = vadd.f32 1.0, %v4094_v58  ;;  %v1653_v26 = vmul.f32 -0.5, %v4094_v58  ;;  %v1579_v11 = vmul.f32 1.442695, %v1537_v22  ;;  %v1656_v44 = vand.u32 2147483647, %v4094_v58 }
 0x1f4   : > { %v4101_v56 = vadd.f32 %v2743_v20, %v4013_v61  ;;  %2995 = vlog2.f32 %v1641_v60  ;;  %v1645_v20 = vadd.f32 1.0, %v1644_v46  ;;  %vm4169_vm11 = vcmp.lt.f32.partialorder %v1647_v1, 0.0004427343 }
 0x1f5   : > { %v1396_v36 = vpop.f32.mrf.mxu1  ;;  %2997 = vlog2.f32 %v1650_v18  ;;  %v1654_v18 = vadd.f32 1.0, %v1653_v26  ;;  %vm4182_vm12 = vcmp.lt.f32.partialorder %v1656_v44, 0.0004427343 }
 0x1f6   : > { %v4109_v9 = vadd.f32 %v4013_v61, %v1396_v36  ;;  %v4113_v45 = vpop.eup %2983  ;;  %v4117_v38 = vmul.f32 100.0, %v4101_v56  ;;  %2999 = vpow2.f32 %v1577_v55  ;;  %v1646_v22 = vmul.f32 %v4092_v42, %v1645_v20 }
 0x1f7   : > { %v1659_v3 = vadd.f32 1.0, %v4113_v45  ;;  %v1662_v55 = vmul.f32 -0.5, %v4113_v45  ;;  %v1665_v36 = vand.u32 2147483647, %v4113_v45 }
 0x1f8   : > { %v4123_v49 = vmul.f32 100.0, %v4109_v9  ;;  %v1540_v4 = vmin.f32 %v4117_v38, 20.0 }
 0x1f9   : > { %v2986_v50 = vpop.eup %2985  ;;  %3001 = vlog2.f32 %v1659_v3  ;;  %v1663_v51 = vadd.f32 1.0, %v1662_v55  ;;  %vm4218_vm14 = vcmp.lt.f32.partialorder %v1665_v36, 0.0004427343 }
 0x1fa   : > { %v2746_v52 = vpop.f32.mrf.mxu1  ;;  %v1634_v32 = vmul.f32 0.6931472, %v2986_v50  ;;  %3003 = vpow2.f32 %v1575_v0  ;;  %v4132_v2 = vpop.eup %2987  ;;  %v1539_v13 = vmin.f32 %v4123_v49, 20.0  ;;  %v1585_v12 = vmul.f32 1.442695, %v1540_v4 }
 0x1fb   : > { %v4137_v15 = vadd.f32 %v2746_v52, %v4013_v61  ;;  %v2990_v60 = vpop.eup %2989  ;;  %3005 = vpow2.f32 %v1581_v43  ;;  %v1668_v23 = vadd.f32 1.0, %v4132_v2  ;;  %v1664_v44 = vmul.f32 %v4113_v45, %v1663_v51 }
 0x1fc   : > { %v1406_v5 = vpop.f32.mrf.mxu1  ;;  %v1625_v19 = vmul.f32 0.6931472, %v2990_v60  ;;  %v1640_v52 = vsel %vm4127_vm6, %v1637_v40, %v1634_v32  ;;  %3007 = vpow2.f32 %v1579_v11  ;;  %v1583_v46 = vmul.f32 1.442695, %v1539_v13  ;;  %v4164_v50 = vpop.eup %2991 }
 0x1fd   : > { %v4148_v35 = vadd.f32 %v4013_v61, %v1406_v5  ;;  %v4156_v48 = vmul.f32 100.0, %v4137_v15  ;;  %v1655_v40 = vmul.f32 %v4094_v58, %v1654_v18  ;;  %v4174_v4 = vpop.eup %2993  ;;  %v1912_v32 = vmul.f32 0.01, %v1640_v52 }
 0x1fe   : > { %v1631_v42 = vsel %vm4140_vm8, %v1628_v54, %v1625_v19  ;;  %3009 = vpow2.f32 %v1585_v12  ;;  %v1677_v21 = vadd.f32 1.0, %v4174_v4  ;;  %vm1952_vm8 = vcmp.gt.f32.partialorder %v4080_v47, 20.0 }
 0x1ff   : > { %v2749_v41 = vpop.f32.mrf.mxu1  ;;  %v4177_v11 = vmul.f32 100.0, %v4148_v35  ;;  %v1911_v13 = vmul.f32 0.01, %v1631_v42  ;;  %3011 = vlog2.f32 %v1668_v23  ;;  %v1542_v58 = vmin.f32 %v4156_v48, 20.0 }
 0x200   : > { %v4159_v3 = vadd.f32 %v2749_v41, %v4013_v61  ;;  %3013 = vpow2.f32 %v1583_v46 }
 0x201   : > { %v1416_v63 = vpop.f32.mrf.mxu1  ;;  %v2996_v20 = vpop.eup %2995  ;;  %v1975_v12 = vsel %vm1943_vm7, %v4022_v33, %v1911_v13  ;;  %v1541_v23 = vmin.f32 %v4177_v11, 20.0  ;;  %3015 = vlog2.f32 %v1677_v21 }
 0x202   : > { %v4162_v5 = vadd.f32 %v4013_v61, %v1416_v63  ;;  %v4190_v60 = vmul.f32 100.0, %v4159_v3  ;;  %v2998_v1 = vpop.eup %2997  ;;  %v1643_v19 = vmul.f32 0.6931472, %v2996_v20  ;;  %2787 = vmatprep.mubr.msk.f32.mxu0 %vm1173_vm4, %v1975_v12 }
 0x203   : > { %v4202_v52 = vpop.eup %2999  ;;  %v1587_v12 = vmul.f32 1.442695, %v1541_v23 }
 0x204   : > { %v2752_v0 = vpop.f32.mrf.mxu1  ;;  %v4193_v63 = vmul.f32 100.0, %v4162_v5  ;;  %v1649_v45 = vsel %vm4169_vm11, %v1646_v22, %v1643_v19  ;;  %v1544_v20 = vmin.f32 %v4190_v60, 20.0 }
 0x205   : > { %v4180_v41 = vadd.f32 %v2752_v0, %v4013_v61  ;;  %v1976_v0 = vsel %vm1944_vm9, %v4016_v37, %v1912_v32  ;;  %v1589_v32 = vmul.f32 1.442695, %v1542_v58  ;;  %vm1951_vm9 = vcmp.gt.f32.partialorder %v4087_v39, 20.0 }
 0x206   : > { %v1426_v43 = vpop.f32.mrf.mxu1  ;;  %v3002_v42 = vpop.eup %3001  ;;  %2788 = vmatmul.mubr.msk.f32.vlgmr.msra.gmra.mxu0 %vm1173_vm4, %v1976_v0  ;;  %v1543_v13 = vmin.f32 %v4193_v63, 20.0 }
 0x207   : > { %4964 = vst [vmem:[#allocation21_spill] sm:$0xff] %v4180_v41  ;;  %v4196_v18 = vadd.f32 %v4013_v61, %v1426_v43  ;;  %v4209_v46 = vmul.f32 100.0, %v4180_v41  ;;  %v1652_v43 = vmul.f32 0.6931472, %v2998_v1  ;;  %v4223_v51 = vpop.eup %3003  ;;  %v1913_v1 = vmul.f32 0.01, %v1649_v45 }
 0x208   : > { %v1661_v26 = vmul.f32 0.6931472, %v3002_v42  ;;  %v4232_v36 = vpop.eup %3005  ;;  %v1671_v45 = vmul.f32 -0.5, %v4132_v2  ;;  %3017 = vpow2.f32 %v1589_v32  ;;  %v1591_v21 = vmul.f32 1.442695, %v1543_v13 }
 0x209   : > { %v1658_v22 = vsel %vm4182_vm12, %v1655_v40, %v1652_v43  ;;  %v1546_v19 = vmin.f32 %v4209_v46, 20.0  ;;  %v1977_v58 = vsel %vm1945_vm10, %v4036_v62, %v1913_v1  ;;  %v4248_v43 = vpop.eup %3007  ;;  %v1593_v62 = vmul.f32 1.442695, %v1544_v20 }
 0x20a   : > { %v2755_v55 = vpop.f32.mrf.mxu1  ;;  %2790 = vmatprep.mubr.msk.f32.mxu0 %vm1173_vm4, %v1977_v58  ;;  %v1914_v40 = vmul.f32 0.01, %v1658_v22  ;;  %v1667_v23 = vsel %vm4218_vm14, %v1664_v44, %v1661_v26  ;;  %3019 = vpow2.f32 %v1587_v12  ;;  %v1672_v37 = vadd.f32 1.0, %v1671_v45 }
 0x20b   : > { %v4213_v33 = vadd.f32 %v2755_v55, %v4013_v61  ;;  %v4228_v55 = vmul.f32 100.0, %v4196_v18  ;;  %v1915_v42 = vmul.f32 0.01, %v1667_v23  ;;  %v4263_v32 = vpop.eup %3009  ;;  %v1597_v20 = vmul.f32 1.442695, %v1546_v19 }
 0x20c   : > { %v1436_v8 = vpop.f32.mrf.mxu1  ;;  %v1978_v22 = vsel %vm1946_vm13, %v4029_v31, %v1914_v40  ;;  %v1674_v31 = vand.u32 2147483647, %v4132_v2  ;;  %v3012_v10 = vpop.eup %3011  ;;  %3021 = vpow2.f32 %v1593_v62  ;;  %vm1953_vm10 = vcmp.gt.f32.partialorder %v4106_v25, 20.0 }
 0x20d   : > { %4967 = vst [vmem:[#allocation30_spill] sm:$0xff] %v4213_v33  ;;  %v4240_v41 = vmul.f32 100.0, %v4213_v33  ;;  %v4243_v54 = vadd.f32 %v4013_v61, %v1436_v8  ;;  %v1545_v1 = vmin.f32 %v4228_v55, 20.0  ;;  %2791 = vmatmul.mubr.msk.f32.gmra.mxu0 %vm1173_vm4, %v1978_v22  ;;  %v1979_v24 = vsel %vm1947_vm15, %v4047_v53, %v1915_v42  ;;  %v4273_v58 = vpop.eup %3013 }
 0x20e   : > { %2793 = vmatprep.mubr.msk.f32.mxu0 %vm1173_vm4, %v1979_v24  ;;  %v1686_v53 = vadd.f32 1.0, %v4164_v50  ;;  %3023 = vpow2.f32 %v1591_v21  ;;  %v1670_v62 = vmul.f32 0.6931472, %v3012_v10  ;;  %v1673_v42 = vmul.f32 %v4132_v2, %v1672_v37  ;;  %v3016_v37 = vpop.eup %3015 }
 0x20f   : > { %v2758_v0 = vpop.f32.mrf.mxu1  ;;  %v1548_v13 = vmin.f32 %v4240_v41, 20.0  ;;  %v4267_v26 = vmul.f32 100.0, %v4243_v54  ;;  %v1595_v19 = vmul.f32 1.442695, %v1545_v1  ;;  %vm1675_vm0 = vcmp.lt.f32.partialorder %v1674_v31, 0.0004427343 }
 0x210   : > { %v4253_v8 = vadd.f32 %v2758_v0, %v4013_v61  ;;  %v1680_v0 = vmul.f32 -0.5, %v4174_v4  ;;  %3025 = vlog2.f32 %v1686_v53  ;;  %v1676_v21 = vsel %vm1675_vm0, %v1673_v42, %v1670_v62 }
 0x211   : > { %v1446_v14 = vpop.f32.mrf.mxu1  ;;  %3027 = vpow2.f32 %v1597_v20  ;;  %v1601_v22 = vmul.f32 1.442695, %v1548_v13  ;;  %v1547_v24 = vmin.f32 %v4267_v26, 20.0  ;;  %v1916_v31 = vmul.f32 0.01, %v1676_v21 }
 0x212   : > { %4970 = vst [vmem:[#allocation41_spill] sm:$0xff] %v4253_v8  ;;  %v4259_v44 = vadd.f32 %v4013_v61, %v1446_v14  ;;  %v4276_v45 = vmul.f32 100.0, %v4253_v8  ;;  %v1681_v1 = vadd.f32 1.0, %v1680_v0  ;;  %v1683_v8 = vand.u32 2147483647, %v4174_v4 }
 0x213   : > { %3029 = vpow2.f32 %v1595_v19  ;;  %v1689_v10 = vmul.f32 -0.5, %v4164_v50  ;;  %v1599_v0 = vmul.f32 1.442695, %v1547_v24  ;;  %v1980_v62 = vsel %vm1948_vm1, %v4044_v57, %v1916_v31 }
 0x214   : > { %4971 = vst [vmem:[#allocation32_spill] sm:$0xff] %v4259_v44  ;;  %4972 = vst [vmem:[#allocation28_spill] sm:$0xff] %v4276_v45  ;;  %v4282_v23 = vmul.f32 100.0, %v4259_v44  ;;  %v1550_v44 = vmin.f32 %v4276_v45, 20.0  ;;  %v1682_v42 = vmul.f32 %v4174_v4, %v1681_v1  ;;  %vm4303_vm2 = vcmp.lt.f32.partialorder %v1683_v8, 0.0004427343  ;;  %2794 = vmatmul.mubr.msk.f32.gmra.mxu0 %vm1173_vm4, %v1980_v62 }
 0x215   : > { %v2761_v12 = vpop.f32.mrf.mxu1  ;;  %v4307_v21 = vpop.eup %3017  ;;  %v1690_v8 = vadd.f32 1.0, %v1689_v10  ;;  %v1704_v1 = vadd.f32 1.0, %v4202_v52  ;;  %v1692_v10 = vand.u32 2147483647, %v4164_v50  ;;  %vm1954_vm13 = vcmp.gt.f32.partialorder %v4098_v16, 20.0 }
 0x216   : > { %v4279_v40 = vadd.f32 %v2761_v12, %v4013_v61  ;;  %4974 = vst [vmem:[#allocation40_spill] sm:$0xff] %v4282_v23  ;;  %v1695_v12 = vadd.f32 1.0, %v4223_v51  ;;  %v1549_v20 = vmin.f32 %v4282_v23, 20.0  ;;  %vm1955_vm15 = vcmp.gt.f32.partialorder %v4123_v49, 20.0 }
 0x217   : > { %v1456_v14 = vpop.f32.mrf.mxu1  ;;  %vm1693_vm6 = vcmp.lt.f32.partialorder %v1692_v10, 0.0004427343  ;;  %v1761_v25 = vmul.f32 -0.5, %v4307_v21 }
 0x218   : > { %4973 = vst [vmem:[#allocation38_spill] sm:$0xff] %v4279_v40  ;;  %v4290_v33 = vmul.f32 100.0, %v4279_v40  ;;  %v4293_v2 = vadd.f32 %v4013_v61, %v1456_v14  ;;  %3031 = vlog2.f32 %v1695_v12  ;;  %v1679_v14 = vmul.f32 0.6931472, %v3016_v37  ;;  %v4320_v37 = vpop.eup %3019 }
 0x219   : > { %3033 = vpow2.f32 %v1601_v22  ;;  %v1605_v12 = vmul.f32 1.442695, %v1550_v44  ;;  %v1603_v57 = vmul.f32 1.442695, %v1549_v20 }
 0x21a   : > { %4975 = vst [vmem:[#allocation6_spill] sm:$0xff] %v4290_v33  ;;  %4976 = vst [vmem:[#allocation34_spill] sm:$0xff] %v4293_v2  ;;  %v1552_v29 = vmin.f32 %v4290_v33, 20.0  ;;  %v4311_v22 = vmul.f32 100.0, %v4293_v2  ;;  %v1685_v4 = vsel %vm4303_vm2, %v1682_v42, %v1679_v14  ;;  %3035 = vpow2.f32 %v1599_v0 }
 0x21b   : > { %v2764_v13 = vpop.f32.mrf.mxu1  ;;  %v1917_v31 = vmul.f32 0.01, %v1685_v4  ;;  %3037 = vlog2.f32 %v1704_v1  ;;  %v1713_v1 = vadd.f32 1.0, %v4248_v43  ;;  %vm1956_vm2 = vcmp.gt.f32.partialorder %v4117_v38, 20.0 }
 0x21c   : > { %v4299_v53 = vadd.f32 %v2764_v13, %v4013_v61  ;;  %4980 = vst [vmem:[#allocation4_spill] sm:$0xff] %v4311_v22  ;;  %v1698_v13 = vmul.f32 -0.5, %v4223_v51  ;;  %3039 = vpow2.f32 %v1605_v12  ;;  %v1609_v62 = vmul.f32 1.442695, %v1552_v29 }
 0x21d   : > { %v1466_v19 = vpop.f32.mrf.mxu1  ;;  %v1551_v0 = vmin.f32 %v4311_v22, 20.0  ;;  %3041 = vpow2.f32 %v1603_v57  ;;  %v1981_v4 = vsel %vm1949_vm3, %v4060_v30, %v1917_v31 }
 0x21e   : > { %4977 = vst [vmem:[#allocation25_spill] sm:$0xff] %v4299_v53  ;;  %v4314_v24 = vadd.f32 %v4013_v61, %v1466_v19  ;;  %v4324_v44 = vmul.f32 100.0, %v4299_v53  ;;  %v4332_v19 = vpop.eup %3021  ;;  %2796 = vmatprep.mubr.msk.f32.mxu0 %vm1173_vm4, %v1981_v4  ;;  %v1699_v57 = vadd.f32 1.0, %v1698_v13  ;;  %3043 = vlog2.f32 %v1713_v1 }
 0x21f   : > { %v4338_v42 = vpop.eup %3023  ;;  %3045 = vpow2.f32 %v1609_v62 }
 0x220   : > { %4981 = vst [vmem:[#allocation46_spill] sm:$0xff] %v4314_v24  ;;  %4982 = vst [vmem:[#allocation37_spill] sm:$0xff] %v4324_v44  ;;  %v4329_v20 = vmul.f32 100.0, %v4314_v24  ;;  %v1691_v24 = vmul.f32 %v4164_v50, %v1690_v8  ;;  %v3026_v2 = vpop.eup %3025  ;;  %v1554_v12 = vmin.f32 %v4324_v44, 20.0  ;;  %v1607_v50 = vmul.f32 1.442695, %v1551_v0 }
 0x221   : > { %v2767_v40 = vpop.f32.mrf.mxu1  ;;  %v4353_v22 = vpop.eup %3027  ;;  %v1688_v28 = vmul.f32 0.6931472, %v3026_v2  ;;  %v1707_v2 = vmul.f32 -0.5, %v4202_v52 }
 0x222   : > { %4983 = vst [vmem:[#allocation9_spill] sm:$0xff] %v4329_v20  ;;  %v4336_v14 = vadd.f32 %v2767_v40, %v4013_v61  ;;  %v1553_v30 = vmin.f32 %v4329_v20, 20.0  ;;  %v1613_v1 = vmul.f32 1.442695, %v1554_v12  ;;  %v1716_v20 = vmul.f32 -0.5, %v4248_v43 }
 0x223   : > { %v1476_v53 = vpop.f32.mrf.mxu1  ;;  %v1694_v44 = vsel %vm1693_vm6, %v1691_v24, %v1688_v28  ;;  %3047 = vpow2.f32 %v1607_v50  ;;  %v1722_v50 = vadd.f32 1.0, %v4232_v36 }
 0x224   : > { %4984 = vst [vmem:[#allocation44_spill] sm:$0xff] %v4336_v14  ;;  %v4347_v29 = vmul.f32 100.0, %v4336_v14  ;;  %v4350_v40 = vadd.f32 %v4013_v61, %v1476_v53  ;;  %v1701_v14 = vand.u32 2147483647, %v4223_v51  ;;  %v4360_v53 = vpop.eup %3029  ;;  %v1918_v62 = vmul.f32 0.01, %v1694_v44 }
 0x225   : > { %v3032_v10 = vpop.eup %3031  ;;  %v1611_v45 = vmul.f32 1.442695, %v1553_v30  ;;  %3049 = vpow2.f32 %v1613_v1  ;;  %v1717_v28 = vadd.f32 1.0, %v1716_v20 }
 0x226   : > { %4985 = vst [vmem:[#allocation8_spill] sm:$0xff] %v4347_v29  ;;  %4986 = vst [vmem:[#allocation36_spill] sm:$0xff] %v4350_v40  ;;  %v4357_v8 = vmul.f32 100.0, %v4350_v40  ;;  %v2770_v31 = vpop.f32.mrf.mxu1  ;;  %v1556_v4 = vmin.f32 %v4347_v29, 20.0  ;;  %v1700_v40 = vmul.f32 %v4223_v51, %v1699_v57  ;;  %v4369_v33 = vpop.eup %3033  ;;  %v1982_v44 = vsel %vm1950_vm5, %v4057_v27, %v1918_v62 }
 0x227   : > { %v4364_v13 = vadd.f32 %v2770_v31, %v4013_v61  ;;  %v1697_v31 = vmul.f32 0.6931472, %v3032_v10  ;;  %vm1702_vm7 = vcmp.lt.f32.partialorder %v1701_v14, 0.0004427343  ;;  %2797 = vmatmul.mubr.msk.f32.gmra.mxu0 %vm1173_vm4, %v1982_v44  ;;  %v1708_v57 = vadd.f32 1.0, %v1707_v2  ;;  %v4385_v10 = vpop.eup %3035 }
 0x228   : > { %v1486_v0 = vpop.f32.mrf.mxu1  ;;  %v1555_v23 = vmin.f32 %v4357_v8, 20.0  ;;  %v1617_v51 = vmul.f32 1.442695, %v1556_v4  ;;  %3051 = vpow2.f32 %v1611_v45  ;;  %v3038_v14 = vpop.eup %3037  ;;  %v1731_v2 = vadd.f32 1.0, %v4273_v58 }
 0x229   : > { %v4373_v29 = vadd.f32 %v4013_v61, %v1486_v0  ;;  %v4376_v24 = vmul.f32 100.0, %v4364_v13  ;;  %v1703_v12 = vsel %vm1702_vm7, %v1700_v40, %v1697_v31  ;;  %v1710_v61 = vand.u32 2147483647, %v4202_v52  ;;  %v4394_v20 = vpop.eup %3039 }
 0x22a   : > { %v1919_v30 = vmul.f32 0.01, %v1703_v12  ;;  %v1615_v27 = vmul.f32 1.442695, %v1555_v23  ;;  %3053 = vlog2.f32 %v1722_v50  ;;  %v1706_v39 = vmul.f32 0.6931472, %v3038_v14  ;;  %v4399_v23 = vpop.eup %3041 }
 0x22b   : > { %v4389_v34 = vmul.f32 100.0, %v4373_v29  ;;  %v1558_v40 = vmin.f32 %v4376_v24, 20.0  ;;  %3055 = vpow2.f32 %v1617_v51  ;;  %v1709_v45 = vmul.f32 %v4202_v52, %v1708_v57  ;;  %v3044_v51 = vpop.eup %3043 }
 0x22c   : > { %v1983_v4 = vsel %vm1951_vm9, %v4075_v17, %v1919_v30  ;;  %vm1711_vm11 = vcmp.lt.f32.partialorder %v1710_v61, 0.0004427343  ;;  %v1718_v1 = vmul.f32 %v4248_v43, %v1717_v28  ;;  %v1719_v17 = vand.u32 2147483647, %v4248_v43  ;;  %v4407_v57 = vpop.eup %3045 }
 0x22d   : > { %2799 = vmatprep.mubr.msk.f32.mxu0 %vm1173_vm4, %v1983_v4  ;;  %3057 = vlog2.f32 %v1731_v2  ;;  %v1557_v62 = vmin.f32 %v4389_v34, 20.0  ;;  %v1712_v0 = vsel %vm1711_vm11, %v1709_v45, %v1706_v39  ;;  %v1725_v31 = vmul.f32 -0.5, %v4232_v36 }
 0x22e   : > { %v1740_v44 = vadd.f32 1.0, %v4263_v32  ;;  %3059 = vpow2.f32 %v1615_v27  ;;  %v1621_v12 = vmul.f32 1.442695, %v1558_v40  ;;  %v1920_v30 = vmul.f32 0.01, %v1712_v0 }
 0x22f   : > { %v1749_v52 = vadd.f32 1.0, %v4320_v37  ;;  %v1715_v61 = vmul.f32 0.6931472, %v3044_v51  ;;  %v1734_v28 = vmul.f32 -0.5, %v4273_v58  ;;  %v1743_v43 = vmul.f32 -0.5, %v4263_v32 }
 0x230   : > { %3061 = vlog2.f32 %v1740_v44  ;;  %v1984_v50 = vsel %vm1952_vm8, %v4070_v7, %v1920_v30  ;;  %vm1720_vm12 = vcmp.lt.f32.partialorder %v1719_v17, 0.0004427343  ;;  %v1728_v14 = vand.u32 2147483647, %v4232_v36  ;;  %v4419_v44 = vpop.eup %3047 }
 0x231   : > { %3063 = vlog2.f32 %v1749_v52  ;;  %v1619_v27 = vmul.f32 1.442695, %v1557_v62  ;;  %2800 = vmatmul.mubr.msk.f32.gmra.mxu0 %vm1173_vm4, %v1984_v50  ;;  %v1721_v40 = vsel %vm1720_vm12, %v1718_v1, %v1715_v61  ;;  %v1726_v4 = vadd.f32 1.0, %v1725_v31 }
 0x232   : > { %v1752_v2 = vmul.f32 -0.5, %v4320_v37  ;;  %3065 = vpow2.f32 %v1621_v12  ;;  %v1921_v39 = vmul.f32 0.01, %v1721_v40  ;;  %v1737_v45 = vand.u32 2147483647, %v4273_v58  ;;  %v4431_v51 = vpop.eup %3049 }
 0x233   : > { %v1758_v0 = vadd.f32 1.0, %v4307_v21  ;;  %v1735_v7 = vadd.f32 1.0, %v1734_v28  ;;  %v1744_v47 = vadd.f32 1.0, %v1743_v43  ;;  %v1746_v17 = vand.u32 2147483647, %v4263_v32 }
 0x234   : > { %v1767_v62 = vadd.f32 1.0, %v4338_v42  ;;  %v1985_v1 = vsel %vm1953_vm10, %v4090_v6, %v1921_v39  ;;  %vm4427_vm14 = vcmp.lt.f32.partialorder %v1728_v14, 0.0004427343  ;;  %v1727_v12 = vmul.f32 %v4232_v36, %v1726_v4 }
 0x235   : > { %3067 = vlog2.f32 %v1758_v0  ;;  %2802 = vmatprep.mubr.msk.f32.mxu0 %vm1173_vm4, %v1985_v1  ;;  %v1753_v30 = vadd.f32 1.0, %v1752_v2  ;;  %v1755_v52 = vand.u32 2147483647, %v4320_v37  ;;  %v4436_v61 = vpop.eup %3051  ;;  %vm4439_vm0 = vcmp.lt.f32.partialorder %v1737_v45, 0.0004427343 }
 0x236   : > { %3069 = vlog2.f32 %v1767_v62  ;;  %v1776_v28 = vadd.f32 1.0, %v4332_v19  ;;  %v1736_v36 = vmul.f32 %v4273_v58, %v1735_v7  ;;  %v1745_v50 = vmul.f32 %v4263_v32, %v1744_v47 }
 0x237   : > { %3071 = vpow2.f32 %v1619_v27  ;;  %v3054_v43 = vpop.eup %3053  ;;  %vm4447_vm1 = vcmp.lt.f32.partialorder %v1746_v17, 0.0004427343  ;;  %v1785_v40 = vadd.f32 1.0, %v4360_v53  ;;  %v1764_v2 = vand.u32 2147483647, %v4307_v21 }
 0x238   : > { %v4452_v27 = vpop.eup %3055  ;;  %v1724_v4 = vmul.f32 0.6931472, %v3054_v43  ;;  %v1770_v39 = vmul.f32 -0.5, %v4338_v42  ;;  %3073 = vlog2.f32 %v1776_v28  ;;  %v1754_v58 = vmul.f32 %v4320_v37, %v1753_v30 }
 0x239   : > { %vm4458_vm3 = vcmp.lt.f32.partialorder %v1755_v52, 0.0004427343  ;;  %3075 = vlog2.f32 %v1785_v40  ;;  %v1794_v0 = vadd.f32 1.0, %v4353_v22  ;;  %vm1957_vm5 = vcmp.gt.f32.partialorder %v4177_v11, 20.0 }
 0x23a   : > { %v3058_v45 = vpop.eup %3057  ;;  %v1730_v7 = vsel %vm4427_vm14, %v1727_v12, %v1724_v4  ;;  %v1762_v17 = vadd.f32 1.0, %v1761_v25  ;;  %v1773_v62 = vand.u32 2147483647, %v4338_v42  ;;  %v1779_v37 = vmul.f32 -0.5, %v4332_v19 }
 0x23b   : > { %v1733_v47 = vmul.f32 0.6931472, %v3058_v45  ;;  %v4467_v1 = vpop.eup %3059  ;;  %v1922_v28 = vmul.f32 0.01, %v1730_v7  ;;  %v1788_v30 = vmul.f32 -0.5, %v4360_v53  ;;  %3077 = vlog2.f32 %v1794_v0 }
 0x23c   : > { %vm4473_vm6 = vcmp.lt.f32.partialorder %v1764_v2, 0.0004427343  ;;  %v1771_v31 = vadd.f32 1.0, %v1770_v39  ;;  %v1803_v12 = vadd.f32 1.0, %v4385_v10  ;;  %v1782_v0 = vand.u32 2147483647, %v4332_v19 }
 0x23d   : > { %v3062_v52 = vpop.eup %3061  ;;  %v1739_v43 = vsel %vm4439_vm0, %v1736_v36, %v1733_v47  ;;  %v1986_v4 = vsel %vm1954_vm13, %v4083_v59, %v1922_v28  ;;  %vm1958_vm7 = vcmp.gt.f32.partialorder %v4156_v48, 20.0  ;;  %v1763_v36 = vmul.f32 %v4307_v21, %v1762_v17 }
 0x23e   : > { %v3064_v25 = vpop.eup %3063  ;;  %v1923_v45 = vmul.f32 0.01, %v1739_v43  ;;  %v1742_v7 = vmul.f32 0.6931472, %v3062_v52  ;;  %2803 = vmatmul.mubr.msk.f32.gmra.mxu0 %vm1173_vm4, %v1986_v4  ;;  %vm4485_vm8 = vcmp.lt.f32.partialorder %v1773_v62, 0.0004427343  ;;  %3079 = vlog2.f32 %v1803_v12 }
 0x23f   : > { %v1751_v6 = vmul.f32 0.6931472, %v3064_v25  ;;  %v4489_v39 = vpop.eup %3065  ;;  %vm1959_vm9 = vcmp.gt.f32.partialorder %v4193_v63, 20.0  ;;  %v1780_v47 = vadd.f32 1.0, %v1779_v37  ;;  %v1789_v28 = vadd.f32 1.0, %v1788_v30 }
 0x240   : > { %v1987_v59 = vsel %vm1955_vm15, %v4109_v9, %v1923_v45  ;;  %v1748_v16 = vsel %vm4447_vm1, %v1745_v50, %v1742_v7  ;;  %v1797_v62 = vmul.f32 -0.5, %v4353_v22  ;;  %v1812_v52 = vadd.f32 1.0, %v4369_v33 }
 0x241   : > { %2805 = vmatprep.mubr.msk.f32.mxu0 %vm1173_vm4, %v1987_v59  ;;  %v1924_v21 = vmul.f32 0.01, %v1748_v16  ;;  %v1757_v17 = vsel %vm4458_vm3, %v1754_v58, %v1751_v6  ;;  %v1772_v49 = vmul.f32 %v4338_v42, %v1771_v31  ;;  %vm4503_vm10 = vcmp.lt.f32.partialorder %v1782_v0, 0.0004427343 }
 0x242   : > { %v3068_v43 = vpop.eup %3067  ;;  %v1925_v12 = vmul.f32 0.01, %v1757_v17  ;;  %v1791_v50 = vand.u32 2147483647, %v4360_v53  ;;  %vm1960_vm11 = vcmp.gt.f32.partialorder %v4190_v60, 20.0  ;;  %v1806_v37 = vmul.f32 -0.5, %v4385_v10 }
 0x243   : > { %v3070_v14 = vpop.eup %3069  ;;  %v1988_v58 = vsel %vm1956_vm2, %v4101_v56, %v1924_v21  ;;  %v1760_v32 = vmul.f32 0.6931472, %v3068_v43  ;;  %3081 = vlog2.f32 %v1812_v52  ;;  %vm1961_vm12 = vcmp.gt.f32.partialorder %v4228_v55, 20.0 }
 0x244   : > { %v4513_v30 = vpop.eup %3071  ;;  %2806 = vmatmul.mubr.msk.f32.gmra.mxu0 %vm1173_vm4, %v1988_v58  ;;  %v1989_v42 = vsel %vm1957_vm5, %v4148_v35, %v1925_v12  ;;  %v1769_v31 = vmul.f32 0.6931472, %v3070_v14  ;;  %v1781_v25 = vmul.f32 %v4332_v19, %v1780_v47  ;;  %v1821_v38 = vadd.f32 1.0, %v4399_v23 }
 0x245   : > { %2808 = vmatprep.mubr.msk.f32.mxu0 %vm1173_vm4, %v1989_v42  ;;  %v1766_v56 = vsel %vm4473_vm6, %v1763_v36, %v1760_v32  ;;  %v1790_v4 = vmul.f32 %v4360_v53, %v1789_v28  ;;  %v1798_v45 = vadd.f32 1.0, %v1797_v62  ;;  %v1800_v7 = vand.u32 2147483647, %v4353_v22  ;;  %v3074_v0 = vpop.eup %3073  ;;  %v5005_v62 = vld [vmem:[#allocation40_spill] sm:$0xff] }
 0x246   : > { %v1926_v6 = vmul.f32 0.01, %v1766_v56  ;;  %v1775_v35 = vsel %vm4485_vm8, %v1772_v49, %v1769_v31  ;;  %3083 = vlog2.f32 %v1821_v38  ;;  %v1830_v11 = vadd.f32 1.0, %v4394_v20  ;;  %v3076_v19 = vpop.eup %3075 }
 0x247   : > { %v1927_v59 = vmul.f32 0.01, %v1775_v35  ;;  %v1778_v16 = vmul.f32 0.6931472, %v3074_v0  ;;  %v1807_v47 = vadd.f32 1.0, %v1806_v37  ;;  %v1815_v40 = vmul.f32 -0.5, %v4369_v33 }
 0x248   : > { %v1990_v53 = vsel %vm1958_vm7, %v4137_v15, %v1926_v6  ;;  %v1787_v36 = vmul.f32 0.6931472, %v3076_v19  ;;  %vm1792_vm13 = vcmp.lt.f32.partialorder %v1791_v50, 0.0004427343  ;;  %3085 = vlog2.f32 %v1830_v11  ;;  %v3078_v28 = vpop.eup %3077 }
 0x249   : > { %2809 = vmatmul.mubr.msk.f32.gmra.mxu0 %vm1173_vm4, %v1990_v53  ;;  %v1991_v2 = vsel %vm1959_vm9, %v4162_v5, %v1927_v59  ;;  %v1784_v21 = vsel %vm4503_vm10, %v1781_v25, %v1778_v16  ;;  %v1799_v17 = vmul.f32 %v4353_v22, %v1798_v45  ;;  %vm4541_vm14 = vcmp.lt.f32.partialorder %v1800_v7, 0.0004427343  ;;  %v5003_v25 = vld [vmem:[#allocation21_spill] sm:$0xff] }
 0x24a   : > { %2811 = vmatprep.mubr.msk.f32.mxu0 %vm1173_vm4, %v1991_v2  ;;  %v1928_v15 = vmul.f32 0.01, %v1784_v21  ;;  %v1793_v48 = vsel %vm1792_vm13, %v1790_v4, %v1787_v36  ;;  %v1796_v52 = vmul.f32 0.6931472, %v3078_v28  ;;  %v1809_v43 = vand.u32 2147483647, %v4385_v10 }
 0x24b   : > { %v1929_v12 = vmul.f32 0.01, %v1793_v48  ;;  %v1808_v63 = vmul.f32 %v4385_v10, %v1807_v47  ;;  %v1816_v5 = vadd.f32 1.0, %v1815_v40  ;;  %v1839_v49 = vadd.f32 1.0, %v4419_v44  ;;  %v3080_v9 = vpop.eup %3079  ;;  %v5004_v36 = vld [vmem:[#allocation30_spill] sm:$0xff] }
 0x24c   : > { %v1992_v22 = vsel %vm1960_vm11, %v4159_v3, %v1928_v15  ;;  %v1802_v50 = vsel %vm4541_vm14, %v1799_v17, %v1796_v52  ;;  %v1824_v14 = vmul.f32 -0.5, %v4399_v23  ;;  %v1833_v58 = vmul.f32 -0.5, %v4394_v20  ;;  %v5006_v52 = vld [vmem:[#allocation28_spill] sm:$0xff] }
 0x24d   : > { %2812 = vmatmul.mubr.msk.f32.gmra.mxu0 %vm1173_vm4, %v1992_v22  ;;  %v1993_v10 = vsel %vm1961_vm12, %v4196_v18, %v1929_v12  ;;  %v1930_v32 = vmul.f32 0.01, %v1802_v50  ;;  %v1805_v37 = vmul.f32 0.6931472, %v3080_v9  ;;  %3087 = vlog2.f32 %v1839_v49  ;;  %v5008_v9 = vld [vmem:[#allocation6_spill] sm:$0xff] }
 0x24e   : > { %vm1962_vm15 = vcmp.gt.f32.partialorder %v4209_v46, 20.0  ;;  %2814 = vmatprep.mubr.msk.f32.mxu0 %vm1173_vm4, %v1993_v10  ;;  %vm1810_vm0 = vcmp.lt.f32.partialorder %v1809_v43, 0.0004427343  ;;  %v1818_v3 = vand.u32 2147483647, %v4369_v33  ;;  %v1848_v60 = vadd.f32 1.0, %v4407_v57 }
 0x24f   : > { %vm1963_vm1 = vcmp.gt.f32.partialorder %v4267_v26, 20.0  ;;  %v1811_v42 = vsel %vm1810_vm0, %v1808_v63, %v1805_v37  ;;  %v1817_v31 = vmul.f32 %v4369_v33, %v1816_v5  ;;  %v1857_v55 = vadd.f32 1.0, %v4436_v61  ;;  %v5007_v43 = vld [vmem:[#allocation32_spill] sm:$0xff] }
 0x250   : > { %v3082_v18 = vpop.eup %3081  ;;  %v1994_v38 = vsel %vm1962_vm15, %v5003_v25, %v1930_v32  ;;  %v1931_v56 = vmul.f32 0.01, %v1811_v42  ;;  %v1825_v4 = vadd.f32 1.0, %v1824_v14  ;;  %3089 = vlog2.f32 %v1848_v60 }
 0x251   : > { %2815 = vmatmul.mubr.msk.f32.gmra.mxu0 %vm1173_vm4, %v1994_v38  ;;  %v1814_v46 = vmul.f32 0.6931472, %v3082_v18  ;;  %v1827_v45 = vand.u32 2147483647, %v4399_v23  ;;  %v1834_v7 = vadd.f32 1.0, %v1833_v58  ;;  %3091 = vlog2.f32 %v1857_v55  ;;  %v5009_v58 = vld [vmem:[#allocation41_spill] sm:$0xff] }
 0x252   : > { %v1995_v26 = vsel %vm1963_vm1, %v4243_v54, %v1931_v56  ;;  %vm1819_vm2 = vcmp.lt.f32.partialorder %v1818_v3, 0.0004427343  ;;  %v1836_v33 = vand.u32 2147483647, %v4394_v20  ;;  %v1866_v0 = vadd.f32 1.0, %v4431_v51  ;;  %v5010_v55 = vld [vmem:[#allocation4_spill] sm:$0xff] }
 0x253   : > { %v3084_v6 = vpop.eup %3083  ;;  %vm1964_vm3 = vcmp.gt.f32.partialorder %v4240_v41, 20.0  ;;  %2817 = vmatprep.mubr.msk.f32.mxu0 %vm1173_vm4, %v1995_v26  ;;  %v1820_v35 = vsel %vm1819_vm2, %v1817_v31, %v1814_v46  ;;  %v1842_v11 = vmul.f32 -0.5, %v4419_v44  ;;  %v1826_v16 = vmul.f32 %v4399_v23, %v1825_v4 }
 0x254   : > { %v1932_v19 = vmul.f32 0.01, %v1820_v35  ;;  %v1823_v59 = vmul.f32 0.6931472, %v3084_v6  ;;  %3093 = vlog2.f32 %v1866_v0  ;;  %vm1828_vm5 = vcmp.lt.f32.partialorder %v1827_v45, 0.0004427343 }
 0x255   : > { %v3086_v47 = vpop.eup %3085  ;;  %v1835_v54 = vmul.f32 %v4394_v20, %v1834_v7  ;;  %v1851_v40 = vmul.f32 -0.5, %v4407_v57  ;;  %v1875_v53 = vadd.f32 1.0, %v4467_v1  ;;  %vm1837_vm6 = vcmp.lt.f32.partialorder %v1836_v33, 0.0004427343  ;;  %v5011_v33 = vld [vmem:[#allocation34_spill] sm:$0xff] }
 0x256   : > { %v1996_v41 = vsel %vm1964_vm3, %v5004_v36, %v1932_v19  ;;  %v1829_v28 = vsel %vm1828_vm5, %v1826_v16, %v1823_v59  ;;  %v1832_v2 = vmul.f32 0.6931472, %v3086_v47  ;;  %v1843_v17 = vadd.f32 1.0, %v1842_v11  ;;  %v5013_v36 = vld [vmem:[#allocation38_spill] sm:$0xff] }
 0x257   : > { %2818 = vmatmul.mubr.msk.f32.gmra.mxu0 %vm1173_vm4, %v1996_v41  ;;  %v1933_v21 = vmul.f32 0.01, %v1829_v28  ;;  %v1860_v23 = vmul.f32 -0.5, %v4436_v61  ;;  %3095 = vlog2.f32 %v1875_v53  ;;  %vm1965_vm7 = vcmp.gt.f32.partialorder %v5005_v62, 20.0  ;;  %v5012_v53 = vld [vmem:[#allocation9_spill] sm:$0xff] }
 0x258   : > { %v1838_v15 = vsel %vm1837_vm6, %v1835_v54, %v1832_v2  ;;  %v1845_v20 = vand.u32 2147483647, %v4419_v44  ;;  %v1884_v48 = vadd.f32 1.0, %v4452_v27  ;;  %vm1966_vm8 = vcmp.gt.f32.partialorder %v5006_v52, 20.0  ;;  %v5014_v2 = vld [vmem:[#allocation46_spill] sm:$0xff]  ;;  %v5015_v52 = vld [vmem:[#allocation37_spill] sm:$0xff] }
 0x259   : > { %v1997_v12 = vsel %vm1965_vm7, %v5007_v43, %v1933_v21  ;;  %v1934_v63 = vmul.f32 0.01, %v1838_v15  ;;  %v1852_v5 = vadd.f32 1.0, %v1851_v40  ;;  %vm1968_vm9 = vcmp.gt.f32.partialorder %v5008_v9, 20.0 }
 0x25a   : > { %v3088_v49 = vpop.eup %3087  ;;  %2820 = vmatprep.mubr.msk.f32.mxu0 %vm1173_vm4, %v1997_v12  ;;  %v1854_v22 = vand.u32 2147483647, %v4407_v57  ;;  %v1869_v50 = vmul.f32 -0.5, %v4431_v51  ;;  %3097 = vlog2.f32 %v1884_v48  ;;  %v1893_v14 = vadd.f32 1.0, %v4513_v30 }
 0x25b   : > { %v1998_v10 = vsel %vm1966_vm8, %v5009_v58, %v1934_v63  ;;  %v1841_v32 = vmul.f32 0.6931472, %v3088_v49  ;;  %v1844_v37 = vmul.f32 %v4419_v44, %v1843_v17  ;;  %v1861_v3 = vadd.f32 1.0, %v1860_v23  ;;  %v5016_v63 = vld [vmem:[#allocation25_spill] sm:$0xff] }
 0x25c   : > { %2821 = vmatmul.mubr.msk.f32.gmra.mxu0 %vm1173_vm4, %v1998_v10  ;;  %vm1846_vm10 = vcmp.lt.f32.partialorder %v1845_v20, 0.0004427343  ;;  %v1863_v60 = vand.u32 2147483647, %v4436_v61  ;;  %3099 = vlog2.f32 %v1893_v14  ;;  %v1902_v42 = vadd.f32 1.0, %v4489_v39 }
 0x25d   : > { %v3090_v31 = vpop.eup %3089  ;;  %vm1967_vm11 = vcmp.gt.f32.partialorder %v5010_v55, 20.0  ;;  %v1847_v18 = vsel %vm1846_vm10, %v1844_v37, %v1841_v32  ;;  %v1853_v25 = vmul.f32 %v4407_v57, %v1852_v5  ;;  %v1878_v38 = vmul.f32 -0.5, %v4467_v1  ;;  %v5017_v32 = vld [vmem:[#allocation36_spill] sm:$0xff] }
 0x25e   : > { %v3092_v56 = vpop.eup %3091  ;;  %v1935_v4 = vmul.f32 0.01, %v1847_v18  ;;  %v1850_v44 = vmul.f32 0.6931472, %v3090_v31  ;;  %v1870_v46 = vadd.f32 1.0, %v1869_v50  ;;  %3101 = vlog2.f32 %v1902_v42  ;;  %v5018_v18 = vld [vmem:[#allocation8_spill] sm:$0xff] }
 0x25f   : > { %vm1855_vm12 = vcmp.lt.f32.partialorder %v1854_v22, 0.0004427343  ;;  %v1859_v45 = vmul.f32 0.6931472, %v3092_v56  ;;  %v1862_v7 = vmul.f32 %v4436_v61, %v1861_v3  ;;  %v1872_v26 = vand.u32 2147483647, %v4431_v51 }
 0x260   : > { %v1999_v0 = vsel %vm1967_vm11, %v5011_v33, %v1935_v4  ;;  %v1856_v6 = vsel %vm1855_vm12, %v1853_v25, %v1850_v44  ;;  %vm1864_vm13 = vcmp.lt.f32.partialorder %v1863_v60, 0.0004427343  ;;  %v1887_v35 = vmul.f32 -0.5, %v4452_v27 }
 0x261   : > { %v3094_v57 = vpop.eup %3093  ;;  %2823 = vmatprep.mubr.msk.f32.mxu0 %vm1173_vm4, %v1999_v0  ;;  %v1936_v11 = vmul.f32 0.01, %v1856_v6  ;;  %v1865_v19 = vsel %vm1864_vm13, %v1862_v7, %v1859_v45  ;;  %v1879_v59 = vadd.f32 1.0, %v1878_v38  ;;  %v1881_v16 = vand.u32 2147483647, %v4467_v1  ;;  %v5019_v38 = vld [vmem:[#allocation44_spill] sm:$0xff] }
 0x262   : > { %v1937_v47 = vmul.f32 0.01, %v1865_v19  ;;  %v1868_v54 = vmul.f32 0.6931472, %v3094_v57  ;;  %v1871_v61 = vmul.f32 %v4431_v51, %v1870_v46  ;;  %v1896_v40 = vmul.f32 -0.5, %v4513_v30 }
 0x263   : > { %vm1969_vm14 = vcmp.gt.f32.partialorder %v5012_v53, 20.0  ;;  %v2000_v41 = vsel %vm1968_vm9, %v5013_v36, %v1936_v11  ;;  %vm1873_vm15 = vcmp.lt.f32.partialorder %v1872_v26, 0.0004427343  ;;  %v1888_v23 = vadd.f32 1.0, %v1887_v35 }
 0x264   : > { %v3096_v28 = vpop.eup %3095  ;;  %2824 = vmatmul.mubr.msk.f32.gmra.mxu0 %vm1173_vm4, %v2000_v41  ;;  %v2001_v21 = vsel %vm1969_vm14, %v5014_v2, %v1937_v47  ;;  %v1874_v17 = vsel %vm1873_vm15, %v1871_v61, %v1868_v54  ;;  %v1905_v62 = vmul.f32 -0.5, %v4489_v39  ;;  %v1880_v20 = vmul.f32 %v4467_v1, %v1879_v59 }
 0x265   : > { %2826 = vmatprep.mubr.msk.f32.mxu0 %vm1173_vm4, %v2001_v21  ;;  %v1938_v51 = vmul.f32 0.01, %v1874_v17  ;;  %v1877_v15 = vmul.f32 0.6931472, %v3096_v28  ;;  %v1890_v48 = vand.u32 2147483647, %v4452_v27  ;;  %v1889_v14 = vmul.f32 %v4452_v27, %v1888_v23 }
 0x266   : > { %vm1970_vm0 = vcmp.gt.f32.partialorder %v5015_v52, 20.0  ;;  %vm1882_vm1 = vcmp.lt.f32.partialorder %v1881_v16, 0.0004427343  ;;  %v1897_v43 = vadd.f32 1.0, %v1896_v40  ;;  %v1899_v9 = vand.u32 2147483647, %v4513_v30 }
 0x267   : > { %v3098_v12 = vpop.eup %3097  ;;  %v2002_v5 = vsel %vm1970_vm0, %v5016_v63, %v1938_v51  ;;  %v1883_v49 = vsel %vm1882_vm1, %v1880_v20, %v1877_v15  ;;  %v1906_v58 = vadd.f32 1.0, %v1905_v62  ;;  %vm1971_vm2 = vcmp.gt.f32.partialorder %v4357_v8, 20.0 }
 0x268   : > { %2827 = vmatmul.mubr.msk.f32.gmra.mxu0 %vm1173_vm4, %v2002_v5  ;;  %v1939_v22 = vmul.f32 0.01, %v1883_v49  ;;  %v1886_v50 = vmul.f32 0.6931472, %v3098_v12  ;;  %vm1891_vm3 = vcmp.lt.f32.partialorder %v1890_v48, 0.0004427343  ;;  %v1898_v42 = vmul.f32 %v4513_v30, %v1897_v43 }
 0x269   : > { %v3100_v1 = vpop.eup %3099  ;;  %v1908_v10 = vand.u32 2147483647, %v4489_v39  ;;  %vm1900_vm5 = vcmp.lt.f32.partialorder %v1899_v9, 0.0004427343  ;;  %vm1972_vm6 = vcmp.gt.f32.partialorder %v5018_v18, 20.0  ;;  %v1907_v8 = vmul.f32 %v4489_v39, %v1906_v58 }
 0x26a   : > { %v2003_v37 = vsel %vm1971_vm2, %v5017_v32, %v1939_v22  ;;  %v1892_v3 = vsel %vm1891_vm3, %v1889_v14, %v1886_v50  ;;  %v1895_v60 = vmul.f32 0.6931472, %v3100_v1  ;;  %vm1973_vm8 = vcmp.gt.f32.partialorder %v4389_v34, 20.0  ;;  %v4642_v39 = vld [vmem:[%s4724_s6] ss:$0 sm:$0xff] }
 0x26b   : > { %v3102_v31 = vpop.eup %3101  ;;  %2829 = vmatprep.mubr.msk.f32.mxu0 %vm1173_vm4, %v2003_v37  ;;  %v1940_v55 = vmul.f32 0.01, %v1892_v3  ;;  %vm1909_vm7 = vcmp.lt.f32.partialorder %v1908_v10, 0.0004427343  ;;  %vm1974_vm9 = vcmp.gt.f32.partialorder %v4376_v24, 20.0 }
 0x26c   : > { %v1901_v27 = vsel %vm1900_vm5, %v1898_v42, %v1895_v60  ;;  %v1904_v25 = vmul.f32 0.6931472, %v3102_v31 }
 0x26d   : > { %v2004_v56 = vsel %vm1972_vm6, %v5019_v38, %v1940_v55  ;;  %v1941_v4 = vmul.f32 0.01, %v1901_v27 }
 0x26e   : > { %2830 = vmatmul.mubr.msk.f32.gmra.mxu0 %vm1173_vm4, %v2004_v56  ;;  %v1910_v30 = vsel %vm1909_vm7, %v1907_v8, %v1904_v25 }
 0x26f   : > { %v2005_v44 = vsel %vm1973_vm8, %v4373_v29, %v1941_v4  ;;  %v1942_v46 = vmul.f32 0.01, %v1910_v30 }
 0x270   : > { %2832 = vmatprep.mubr.msk.f32.mxu0 %vm1173_vm4, %v2005_v44 }
 0x271   : > { %v2006_v45 = vsel %vm1974_vm9, %v4364_v13, %v1942_v46 }
 0x272   : > { %2833 = vmatmul.mubr.msk.f32.gmra.mxu0 %vm1173_vm4, %v2006_v45 }
 0x2c6   : > { %v2789_v29 = vpop.f32.mrf.mxu0 }
 0x2c7   : > { %v2190_v13 = vadd.f32 %v2789_v29, %v4642_v39 }
 0x2c8   : > { %v2184_v24 = vpop.f32.mrf.mxu0 }
 0x2c9   : > { %2344 = vst [vmem:[%s4649_s12 + $0x8] sm:$0xff] %v2190_v13  ;;  %v2185_v34 = vadd.f32 %v4642_v39, %v2184_v24 }
 0x2cb   : > { %2343 = vst [vmem:[%s4649_s12] sm:$0xff] %v2185_v34 }
 0x2cd   : > { %v2792_v7 = vpop.f32.mrf.mxu0 }
 0x2ce   : > { %v2200_v26 = vadd.f32 %v2792_v7, %v4642_v39 }
 0x2cf   : > { %v2194_v33 = vpop.f32.mrf.mxu0 }
 0x2d0   : > { %2346 = vst [vmem:[%s4649_s12 + $0x18] sm:$0xff] %v2200_v26  ;;  %v2195_v0 = vadd.f32 %v4642_v39, %v2194_v33 }
 0x2d2   : > { %2345 = vst [vmem:[%s4649_s12 + $0x10] sm:$0xff] %v2195_v0 }
 0x2d4   : > { %v2795_v6 = vpop.f32.mrf.mxu0 }
 0x2d5   : > { %v2210_v35 = vadd.f32 %v2795_v6, %v4642_v39 }
 0x2d6   : > { %v2204_v57 = vpop.f32.mrf.mxu0 }
 0x2d7   : > { %2348 = vst [vmem:[%s4649_s12 + $0x28] sm:$0xff] %v2210_v35  ;;  %v2205_v11 = vadd.f32 %v4642_v39, %v2204_v57 }
 0x2d9   : > { %2347 = vst [vmem:[%s4649_s12 + $0x20] sm:$0xff] %v2205_v11 }
 0x2e7   : > { %v2798_v19 = vpop.f32.mrf.mxu0 }
 0x2e8   : > { %v2220_v59 = vadd.f32 %v2798_v19, %v4642_v39 }
 0x2e9   : > { %v2214_v16 = vpop.f32.mrf.mxu0 }
 0x2ea   : > { %2350 = vst [vmem:[%s4649_s12 + $0x38] sm:$0xff] %v2220_v59  ;;  %v2215_v47 = vadd.f32 %v4642_v39, %v2214_v16 }
 0x2ec   : > { %2349 = vst [vmem:[%s4649_s12 + $0x30] sm:$0xff] %v2215_v47 }
 0x2f1   : > { %v2801_v54 = vpop.f32.mrf.mxu0 }
 0x2f2   : > { %v2230_v61 = vadd.f32 %v2801_v54, %v4642_v39 }
 0x2f3   : > { %v2224_v40 = vpop.f32.mrf.mxu0 }
 0x2f4   : > { %2352 = vst [vmem:[%s4649_s12 + $0x48] sm:$0xff] %v2230_v61  ;;  %v2225_v53 = vadd.f32 %v4642_v39, %v2224_v40 }
 0x2f6   : > { %2351 = vst [vmem:[%s4649_s12 + $0x40] sm:$0xff] %v2225_v53 }
 0x2fe   : > { %v2804_v36 = vpop.f32.mrf.mxu0 }
 0x2ff   : > { %v2240_v41 = vadd.f32 %v2804_v36, %v4642_v39 }
 0x300   : > { %v2234_v28 = vpop.f32.mrf.mxu0 }
 0x301   : > { %2354 = vst [vmem:[%s4649_s12 + $0x58] sm:$0xff] %v2240_v41  ;;  %v2235_v2 = vadd.f32 %v4642_v39, %v2234_v28 }
 0x303   : > { %2353 = vst [vmem:[%s4649_s12 + $0x50] sm:$0xff] %v2235_v2 }
 0x304   : > { %v2807_v21 = vpop.f32.mrf.mxu0 }
 0x305   : > { %v2250_v17 = vadd.f32 %v2807_v21, %v4642_v39 }
 0x306   : > { %v2244_v23 = vpop.f32.mrf.mxu0 }
 0x307   : > { %2356 = vst [vmem:[%s4649_s12 + $0x68] sm:$0xff] %v2250_v17  ;;  %v2245_v62 = vadd.f32 %v4642_v39, %v2244_v23 }
 0x309   : > { %2355 = vst [vmem:[%s4649_s12 + $0x60] sm:$0xff] %v2245_v62  ;;  %v2810_v51 = vpop.f32.mrf.mxu0 }
 0x30a   : > { %v2260_v15 = vadd.f32 %v2810_v51, %v4642_v39 }
 0x30b   : > { %v2254_v20 = vpop.f32.mrf.mxu0 }
 0x30c   : > { %2358 = vst [vmem:[%s4649_s12 + $0x78] sm:$0xff] %v2260_v15  ;;  %v2255_v48 = vadd.f32 %v4642_v39, %v2254_v20 }
 0x30d   : > { %v2813_v52 = vpop.f32.mrf.mxu0 }
 0x30e   : > { %2357 = vst [vmem:[%s4649_s12 + $0x70] sm:$0xff] %v2255_v48  ;;  %v2270_v43 = vadd.f32 %v2813_v52, %v4642_v39 }
 0x30f   : > { %v2264_v12 = vpop.f32.mrf.mxu0 }
 0x310   : > { %2360 = vst [vmem:[%s4649_s12 + $0x88] sm:$0xff] %v2270_v43  ;;  %v2265_v63 = vadd.f32 %v4642_v39, %v2264_v12 }
 0x311   : > { %v2816_v5 = vpop.f32.mrf.mxu0 }
 0x312   : > { %2359 = vst [vmem:[%s4649_s12 + $0x80] sm:$0xff] %v2265_v63  ;;  %v2280_v49 = vadd.f32 %v2816_v5, %v4642_v39 }
 0x313   : > { %v2274_v9 = vpop.f32.mrf.mxu0 }
 0x314   : > { %2362 = vst [vmem:[%s4649_s12 + $0x98] sm:$0xff] %v2280_v49  ;;  %v2275_v22 = vadd.f32 %v4642_v39, %v2274_v9 }
 0x316   : > { %2361 = vst [vmem:[%s4649_s12 + $0x90] sm:$0xff] %v2275_v22 }
 0x317   : > { %v2819_v50 = vpop.f32.mrf.mxu0 }
 0x318   : > { %v2290_v14 = vadd.f32 %v2819_v50, %v4642_v39 }
 0x319   : > { %v2284_v58 = vpop.f32.mrf.mxu0 }
 0x31a   : > { %2364 = vst [vmem:[%s4649_s12 + $0xa8] sm:$0xff] %v2290_v14  ;;  %v2285_v1 = vadd.f32 %v4642_v39, %v2284_v58 }
 0x31c   : > { %2363 = vst [vmem:[%s4649_s12 + $0xa0] sm:$0xff] %v2285_v1  ;;  %v2822_v10 = vpop.f32.mrf.mxu0 }
 0x31d   : > { %v2300_v32 = vadd.f32 %v2822_v10, %v4642_v39 }
 0x31e   : > { %v2294_v37 = vpop.f32.mrf.mxu0 }
 0x31f   : > { %2366 = vst [vmem:[%s4649_s12 + $0xb8] sm:$0xff] %v2300_v32  ;;  %v2295_v3 = vadd.f32 %v4642_v39, %v2294_v37 }
 0x321   : > { %2365 = vst [vmem:[%s4649_s12 + $0xb0] sm:$0xff] %v2295_v3 }
 0x324   : > { %v2825_v60 = vpop.f32.mrf.mxu0 }
 0x325   : > { %v2310_v42 = vadd.f32 %v2825_v60, %v4642_v39 }
 0x326   : > { %v2304_v31 = vpop.f32.mrf.mxu0 }
 0x327   : > { %2368 = vst [vmem:[%s4649_s12 + $0xc8] sm:$0xff] %v2310_v42  ;;  %v2305_v55 = vadd.f32 %v4642_v39, %v2304_v31 }
 0x328   : > { %v2828_v18 = vpop.f32.mrf.mxu0 }
 0x329   : > { %2367 = vst [vmem:[%s4649_s12 + $0xc0] sm:$0xff] %v2305_v55  ;;  %v2320_v27 = vadd.f32 %v2828_v18, %v4642_v39 }
 0x32a   : > { %v2314_v25 = vpop.f32.mrf.mxu0 }
 0x32b   : > { %2370 = vst [vmem:[%s4649_s12 + $0xd8] sm:$0xff] %v2320_v27  ;;  %v2315_v8 = vadd.f32 %v4642_v39, %v2314_v25 }
 0x32d   : > { %2369 = vst [vmem:[%s4649_s12 + $0xd0] sm:$0xff] %v2315_v8 }
 0x32e   : > { %v2831_v38 = vpop.f32.mrf.mxu0 }
 0x32f   : > { %v2330_v56 = vadd.f32 %v2831_v38, %v4642_v39 }
 0x330   : > { %v2324_v4 = vpop.f32.mrf.mxu0 }
 0x331   : > { %2372 = vst [vmem:[%s4649_s12 + $0xe8] sm:$0xff] %v2330_v56  ;;  %v2325_v30 = vadd.f32 %v4642_v39, %v2324_v4 }
 0x332   : > { %v2834_v44 = vpop.f32.mrf.mxu0 }
 0x333   : > { %2371 = vst [vmem:[%s4649_s12 + $0xe0] sm:$0xff] %v2325_v30  ;;  %v2340_v46 = vadd.f32 %v2834_v44, %v4642_v39 }
 0x334   : > { %v2334_v45 = vpop.f32.mrf.mxu0 }
 0x335   : > { %2374 = vst [vmem:[%s4649_s12 + $0xf8] sm:$0xff] %v2340_v46  ;;  %v2335_v29 = vadd.f32 %v4642_v39, %v2334_v45 }
 0x337   : > { %2373 = vst [vmem:[%s4649_s12 + $0xf0] sm:$0xff] %v2335_v29 }
 0x338 PF: > { %s17_s24 = sadd.s32 1, %s3109_s24  }
 0x339   : > { %p14_p4 = scmp.ge.s32.totalorder %s17_s24, 4  }
 0x33b   :  { %16 = sbr.rel (!%p14_p4) target bundleno = 1 (0x1), region = 78 }

</bundles_post_ra>
